<compile_context>
chip_gen: v7x
topology: tpu7x:2x2x1
jax: 0.10.0
libtpu: 0.0.40
codegen_flags: <defaults>
</compile_context>

<pallas_src>
import functools

import jax
import jax.numpy as jnp
from jax.experimental import pallas as pl
from jax.experimental.pallas import tpu as pltpu

EPS = 1e-5
LANES = 128

# Decided at startup by _probe_single_buffer(); None => default double buffer.
_CONST_PIPELINE_MODE = None


# ---------------------------------------------------------------------------
# small helpers
# ---------------------------------------------------------------------------
def _round_up(x, m):
    return (x + m - 1) // m * m


def _pad_to(a, shape):
    pads = [(0, t - s) for s, t in zip(a.shape, shape)]
    return jnp.pad(a, pads)


def _hw_config():
    """Generation-conditional VMEM limit and row-tile targets."""
    try:
        vmem = int(pltpu.get_tpu_info().vmem_capacity_bytes)
    except Exception:  # pragma: no cover - conservative fallback
        vmem = 64 * 1024 * 1024
    if vmem >= 96 * 1024 * 1024:
        # v5e / v6e: 128 MiB physical VMEM -> bigger tiles, generous limit.
        return {"vmem_limit": 96 * 1024 * 1024, "rows_a": 1024, "rows_b": 2048}
    # v7x: 64 MiB VMEM per TensorCore -> keep the conservative setup.
    return {"vmem_limit": 48 * 1024 * 1024, "rows_a": 512, "rows_b": 1024}


def _pick_tile(rows, target):
    """Row-tile size: multiple of 16 (bf16 packs 2 rows/sublane); prefer one
    that divides `rows` so no row padding (extra HBM copy) is needed.
    Returns (tile, padded_rows)."""
    if rows <= target:
        tm = _round_up(rows, 16)
        return tm, tm
    top = target - (target % 16)
    for tm in range(top, 15, -16):
        if rows % tm == 0:
            return tm, rows
    return top, _round_up(rows, top)          # rare fallback: pad rows


def _cparams(vmem_limit):
    return pltpu.CompilerParams(
        dimension_semantics=("parallel",),     # independent row tiles
        vmem_limit_bytes=vmem_limit)


def _row_spec(tm, ncols):
    return pl.BlockSpec((tm, ncols), lambda i: (i, 0))


def _const_spec(shape):
    """Whole-array, grid-invariant operand; single-buffered when supported."""
    nd = len(shape)
    idx = lambda i, _nd=nd: (0,) * _nd
    if _CONST_PIPELINE_MODE is not None:
        return pl.BlockSpec(shape, idx, pipeline_mode=_CONST_PIPELINE_MODE)
    return pl.BlockSpec(shape, idx)


def _stat_spec(cp):
    return pl.BlockSpec((1, 1, cp), lambda i: (i, 0, 0))


def _probe_single_buffer():
    """Return pl.Buffered(1) if single-buffered constant operands lower and
    run correctly on this jax/libtpu, else None (default double buffering)."""
    try:
        spec = pl.BlockSpec((8, 128), lambda i: (0, 0),
                            pipeline_mode=pl.Buffered(1))

        def k(x_ref, o_ref):
            o_ref[...] = x_ref[...] + 1.0

        f = pl.pallas_call(
            k,
            out_shape=jax.ShapeDtypeStruct((16, 128), jnp.float32),
            grid=(2,),
            in_specs=[spec],
            out_specs=pl.BlockSpec((8, 128), lambda i: (i, 0)))
        r = jax.block_until_ready(f(jnp.zeros((8, 128), jnp.float32)))
        if bool(jnp.all(r == 1.0)):
            return pl.Buffered(1)
        return None
    except Exception:
        return None


# ---------------------------------------------------------------------------
# Pallas kernels
# ---------------------------------------------------------------------------
def _conv_stats_kernel(cols_ref, w_ref, y_ref, ssum_ref, ssq_ref):
    """Row-tiled im2col matmul (bf16 x bf16 -> f32) + per-tile BN partial sums.

    Stats are accumulated from the f32 accumulator before the bf16 store, so
    halving the y write traffic does not change the statistics.
    """
    y = jnp.dot(cols_ref[...], w_ref[...], preferred_element_type=jnp.float32)
    y_ref[...] = y.astype(y_ref.dtype)
    ssum_ref[...] = jnp.sum(y, axis=0, keepdims=True)[None]
    ssq_ref[...] = jnp.sum(y * y, axis=0, keepdims=True)[None]


def _conv_stats_proj_kernel(cols_ref, w_ref, xs_ref, ws_ref,
                            y_ref, ysc_ref,
                            ssum_ref, ssq_ref, ssum_sc_ref, ssq_sc_ref):
    """Fused: conv2 matmul + 1x1 projection-shortcut matmul, each with stats."""
    y = jnp.dot(cols_ref[...], w_ref[...], preferred_element_type=jnp.float32)
    ysc = jnp.dot(xs_ref[...], ws_ref[...], preferred_element_type=jnp.float32)
    y_ref[...] = y.astype(y_ref.dtype)
    ysc_ref[...] = ysc.astype(ysc_ref.dtype)
    ssum_ref[...] = jnp.sum(y, axis=0, keepdims=True)[None]
    ssq_ref[...] = jnp.sum(y * y, axis=0, keepdims=True)[None]
    ssum_sc_ref[...] = jnp.sum(ysc, axis=0, keepdims=True)[None]
    ssq_sc_ref[...] = jnp.sum(ysc * ysc, axis=0, keepdims=True)[None]


def _bn_relu_kernel(y_ref, scale_ref, shift_ref, out_ref):
    """Apply finalized BN (scale/shift) + ReLU in f32; bf16 in/out."""
    y = y_ref[...].astype(jnp.float32)
    out_ref[...] = jnp.maximum(
        y * scale_ref[...] + shift_ref[...], 0.0).astype(out_ref.dtype)


def _bn_add_relu_proj_kernel(y_ref, s_ref, t_ref, ysc_ref, ssc_ref, tsc_ref,
                             out_ref):
    """BN2(main) + BN_sc(projection shortcut) + add + ReLU (f32 math)."""
    main = y_ref[...].astype(jnp.float32) * s_ref[...] + t_ref[...]
    short = ysc_ref[...].astype(jnp.float32) * ssc_ref[...] + tsc_ref[...]
    out_ref[...] = jnp.maximum(main + short, 0.0).astype(out_ref.dtype)


def _bn_add_relu_id_kernel(y_ref, s_ref, t_ref, xs_ref, out_ref):
    """BN2(main) + identity shortcut + ReLU (f32 math, bf16 in/out)."""
    main = y_ref[...].astype(jnp.float32) * s_ref[...] + t_ref[...]
    out_ref[...] = jnp.maximum(
        main + xs_ref[...].astype(jnp.float32), 0.0).astype(out_ref.dtype)


# ---------------------------------------------------------------------------
# pallas_call wrappers
# ---------------------------------------------------------------------------
def _conv_stats_call(cols, w, tm, cp, vmem_limit):
    mp, k = cols.shape
    nt = mp // tm
    return pl.pallas_call(
        _conv_stats_kernel,
        out_shape=(jax.ShapeDtypeStruct((mp, cp), jnp.bfloat16),
                   jax.ShapeDtypeStruct((nt, 1, cp), jnp.float32),
                   jax.ShapeDtypeStruct((nt, 1, cp), jnp.float32)),
        grid=(nt,),
        in_specs=[_row_spec(tm, k), _const_spec(w.shape)],
        out_specs=(_row_spec(tm, cp), _stat_spec(cp), _stat_spec(cp)),
        compiler_params=_cparams(vmem_limit),
        cost_estimate=pl.CostEstimate(
            flops=2 * mp * k * cp, transcendentals=0,
            bytes_accessed=2 * (cols.size + w.size) + 2 * mp * cp
                           + 8 * nt * cp),
    )(cols, w)


def _conv_stats_proj_call(cols, w, xs, ws, tm, cp, vmem_limit):
    mp, k = cols.shape
    cin = xs.shape[1]
    nt = mp // tm
    return pl.pallas_call(
        _conv_stats_proj_kernel,
        out_shape=(jax.ShapeDtypeStruct((mp, cp), jnp.bfloat16),
                   jax.ShapeDtypeStruct((mp, cp), jnp.bfloat16),
                   jax.ShapeDtypeStruct((nt, 1, cp), jnp.float32),
                   jax.ShapeDtypeStruct((nt, 1, cp), jnp.float32),
                   jax.ShapeDtypeStruct((nt, 1, cp), jnp.float32),
                   jax.ShapeDtypeStruct((nt, 1, cp), jnp.float32)),
        grid=(nt,),
        in_specs=[_row_spec(tm, k), _const_spec(w.shape),
                  _row_spec(tm, cin), _const_spec(ws.shape)],
        out_specs=(_row_spec(tm, cp), _row_spec(tm, cp),
                   _stat_spec(cp), _stat_spec(cp),
                   _stat_spec(cp), _stat_spec(cp)),
        compiler_params=_cparams(vmem_limit),
        cost_estimate=pl.CostEstimate(
            flops=2 * mp * (k + cin) * cp, transcendentals=0,
            bytes_accessed=2 * (cols.size + w.size + xs.size + ws.size)
                           + 4 * mp * cp + 16 * nt * cp),
    )(cols, w, xs, ws)


def _bn_relu_call(y, scale, shift, tm, vmem_limit):
    mp, cp = y.shape
    nt = mp // tm
    return pl.pallas_call(
        _bn_relu_kernel,
        out_shape=jax.ShapeDtypeStruct((mp, cp), jnp.bfloat16),
        grid=(nt,),
        in_specs=[_row_spec(tm, cp), _const_spec(scale.shape),
                  _const_spec(shift.shape)],
        out_specs=_row_spec(tm, cp),
        compiler_params=_cparams(vmem_limit),
        cost_estimate=pl.CostEstimate(
            flops=3 * mp * cp, transcendentals=0,
            bytes_accessed=4 * mp * cp + 8 * cp),
    )(y, scale, shift)


def _bn_add_relu_proj_call(y, s, t, ysc, ssc, tsc, tm, vmem_limit):
    mp, cp = y.shape
    nt = mp // tm
    return pl.pallas_call(
        _bn_add_relu_proj_kernel,
        out_shape=jax.ShapeDtypeStruct((mp, cp), jnp.bfloat16),
        grid=(nt,),
        in_specs=[_row_spec(tm, cp), _const_spec(s.shape), _const_spec(t.shape),
                  _row_spec(tm, cp), _const_spec(ssc.shape),
                  _const_spec(tsc.shape)],
        out_specs=_row_spec(tm, cp),
        compiler_params=_cparams(vmem_limit),
        cost_estimate=pl.CostEstimate(
            flops=6 * mp * cp, transcendentals=0,
            bytes_accessed=6 * mp * cp + 16 * cp),
    )(y, s, t, ysc, ssc, tsc)


def _bn_add_relu_id_call(y, s, t, xs, tm, vmem_limit):
    mp, cp = y.shape
    nt = mp // tm
    return pl.pallas_call(
        _bn_add_relu_id_kernel,
        out_shape=jax.ShapeDtypeStruct((mp, cp), jnp.bfloat16),
        grid=(nt,),
        in_specs=[_row_spec(tm, cp), _const_spec(s.shape), _const_spec(t.shape),
                  _row_spec(tm, cp)],
        out_specs=_row_spec(tm, cp),
        compiler_params=_cparams(vmem_limit),
        cost_estimate=pl.CostEstimate(
            flops=4 * mp * cp, transcendentals=0,
            bytes_accessed=6 * mp * cp + 8 * cp),
    )(y, s, t, xs)


# ---------------------------------------------------------------------------
# Glue: im2col (matches HWIO weight flattening order) + BN stat finalization
# ---------------------------------------------------------------------------
def _im2col(x_nhwc, kh, kw, stride, pad):
    xp = jnp.pad(x_nhwc, ((0, 0), (pad, pad), (pad, pad), (0, 0)))
    n, hp, wp, c = xp.shape
    ho = (hp - kh) // stride + 1
    wo = (wp - kw) // stride + 1
    patches = []
    for i in range(kh):
        for j in range(kw):
            patches.append(
                xp[:, i:i + (ho - 1) * stride + 1:stride,
                      j:j + (wo - 1) * stride + 1:stride, :])
    cols = jnp.concatenate(patches, axis=-1)          # (N, Ho, Wo, KH*KW*C)
    return cols.reshape(n * ho * wo, kh * kw * c), (n, ho, wo)


def _bn_scale_shift(ssum, ssq, count, gamma, beta, cp):
    """Reduce per-tile partial sums and fold BN into per-channel scale/shift.

    Note: var = E[y^2] - E[y]^2 in f32; adequate for conv outputs whose mean
    is small relative to their std (true here), revisit if tolerances tighten.
    """
    s1 = jnp.sum(ssum, axis=(0, 1))                          # (cp,)
    s2 = jnp.sum(ssq, axis=(0, 1))                           # (cp,)
    mean = s1 / count
    var = jnp.maximum(s2 / count - mean * mean, 0.0)         # biased variance
    g = _pad_to(gamma.astype(jnp.float32), (cp,))            # zero-padded chans
    b = _pad_to(beta.astype(jnp.float32), (cp,))
    scale = g * jax.lax.rsqrt(var + EPS)
    shift = b - mean * scale
    return scale.reshape(1, cp), shift.reshape(1, cp)


# ---------------------------------------------------------------------------
# BasicBlock forward
# ---------------------------------------------------------------------------
def basic_block_forward(x_nchw, params, stride):
    cfg = _hw_config()
    vlim = cfg["vmem_limit"]

    x = jnp.transpose(x_nchw, (0, 2, 3, 1)).astype(jnp.float32)   # -> NHWC f32
    n, h, w, cin = x.shape
    cout = params["w1"].shape[-1]
    cp = _round_up(cout, LANES)              # lane-dense channel dimension

    # ---- stage 1: conv1 (3x3, stride, pad 1) -> BN1 -> ReLU ----------------
    cols1, (_, ho, wo) = _im2col(x.astype(jnp.bfloat16), 3, 3, stride, 1)
    rows = n * ho * wo
    tm_a, mp = _pick_tile(rows, cfg["rows_a"])     # matmul+stats tile
    tm_b, _ = _pick_tile(mp, cfg["rows_b"])        # bandwidth-bound tile

    if mp != rows:                                  # rare: only if no divisor
        cols1 = _pad_to(cols1, (mp, cols1.shape[1]))
    w1 = _pad_to(params["w1"].reshape(-1, cout),
                 (9 * cin, cp)).astype(jnp.bfloat16)

    y1, s1a, s1b = _conv_stats_call(cols1, w1, tm_a, cp, vlim)
    sc1, sh1 = _bn_scale_shift(s1a, s1b, rows, params["g1"], params["b1"], cp)
    out1 = _bn_relu_call(y1, sc1, sh1, tm_b, vlim)           # (mp, cp) bf16
    out1_nhwc = out1[:rows, :cout].reshape(n, ho, wo, cout)

    # ---- stage 2: conv2 (3x3, 1, pad 1) -> BN2 ; shortcut ; add ; ReLU -----
    # TODO(synk): in-kernel implicit im2col would remove this ~9x read blowup.
    cols2, _ = _im2col(out1_nhwc, 3, 3, 1, 1)
    if mp != rows:
        cols2 = _pad_to(cols2, (mp, cols2.shape[1]))
    w2 = _pad_to(params["w2"].reshape(-1, cout),
                 (9 * cout, cp)).astype(jnp.bfloat16)

    if stride != 1 or cin != cout:
        # projection shortcut: 1x1 stride-s conv == strided slice + matmul
        xs = x[:, ::stride, ::stride, :].reshape(rows, cin).astype(jnp.bfloat16)
        if mp != rows:
            xs = _pad_to(xs, (mp, cin))
        ws = _pad_to(params["ws"].reshape(cin, cout),
                     (cin, cp)).astype(jnp.bfloat16)
        y2, ysc, s2a, s2b, ssa, ssb = _conv_stats_proj_call(
            cols2, w2, xs, ws, tm_a, cp, vlim)
        sc2, sh2 = _bn_scale_shift(s2a, s2b, rows,
                                   params["g2"], params["b2"], cp)
        scs, shs = _bn_scale_shift(ssa, ssb, rows,
                                   params["gs"], params["bs"], cp)
        out = _bn_add_relu_proj_call(y2, sc2, sh2, ysc, scs, shs, tm_b, vlim)
    else:
        # identity shortcut (bf16 operand, f32 add inside the kernel)
        xs = _pad_to(x.reshape(rows, cin).astype(jnp.bfloat16), (mp, cp))
        y2, s2a, s2b = _conv_stats_call(cols2, w2, tm_a, cp, vlim)
        sc2, sh2 = _bn_scale_shift(s2a, s2b, rows,
                                   params["g2"], params["b2"], cp)
        out = _bn_add_relu_id_call(y2, sc2, sh2, xs, tm_b, vlim)

    # Module interface is NCHW float32; in a full bf16/NHWC network this cast
    # and transpose would be dropped (see TODO at top of file).
    out_nhwc = out[:rows, :cout].astype(jnp.float32).reshape(n, ho, wo, cout)
    return jnp.transpose(out_nhwc, (0, 3, 1, 2))                  # -> NCHW


# ---------------------------------------------------------------------------
# Pure-JAX reference (training-mode BN, bf16 matmul operands, f32 accumulate)
# ---------------------------------------------------------------------------
def _ref_forward(x_nchw, params, stride):
    def conv(x, w_hwio, s, pad):
        w_oihw = jnp.transpose(w_hwio, (3, 2, 0, 1)).astype(jnp.bfloat16)
        return jax.lax.conv_general_dilated(
            x.astype(jnp.bfloat16), w_oihw, window_strides=(s, s),
            padding=[(pad, pad), (pad, pad)],
            dimension_numbers=("NCHW", "OIHW", "NCHW"),
            preferred_element_type=jnp.float32)

    def bn(y, g, b):
        mean = jnp.mean(y, axis=(0, 2, 3), keepdims=True)
        var = jnp.mean((y - mean) ** 2, axis=(0, 2, 3), keepdims=True)
        return ((y - mean) * jax.lax.rsqrt(var + EPS)
                * g.reshape(1, -1, 1, 1) + b.reshape(1, -1, 1, 1))

    cin, cout = x_nchw.shape[1], params["w1"].shape[-1]
    out1 = jax.nn.relu(bn(conv(x_nchw, params["w1"], stride, 1),
                          params["g1"], params["b1"]))
    out = bn(conv(out1, params["w2"], 1, 1), params["g2"], params["b2"])
    if stride != 1 or cin != cout:
        sc = bn(conv(x_nchw, params["ws"], stride, 0),
                params["gs"], params["bs"])
    else:
        sc = x_nchw
    return jax.nn.relu(out + sc)


# ---------------------------------------------------------------------------
if __name__ == "__main__":
    # Decide (on this jax/libtpu) whether constant operands may be
    # single-buffered; falls back to default double buffering otherwise.
    _CONST_PIPELINE_MODE = _probe_single_buffer()

    def make_params(key, cin, cout, proj):
        ks = jax.random.split(key, 9)
        p = {
            "w1": 0.1 * jax.random.normal(ks[0], (3, 3, cin, cout), jnp.float32),
            "g1": 1.0 + 0.1 * jax.random.normal(ks[1], (cout,), jnp.float32),
            "b1": 0.1 * jax.random.normal(ks[2], (cout,), jnp.float32),
            "w2": 0.1 * jax.random.normal(ks[3], (3, 3, cout, cout), jnp.float32),
            "g2": 1.0 + 0.1 * jax.random.normal(ks[4], (cout,), jnp.float32),
            "b2": 0.1 * jax.random.normal(ks[5], (cout,), jnp.float32),
        }
        if proj:
            p["ws"] = 0.1 * jax.random.normal(ks[6], (1, 1, cin, cout), jnp.float32)
            p["gs"] = 1.0 + 0.1 * jax.random.normal(ks[7], (cout,), jnp.float32)
            p["bs"] = 0.1 * jax.random.normal(ks[8], (cout,), jnp.float32)
        return p

    key = jax.random.PRNGKey(0)
    configs = [
        # (n, cin, h, w, cout, stride)
        (2, 4, 16, 16, 8, 2),    # projection shortcut (stride 2, cin != cout)
        (2, 8, 16, 16, 8, 1),    # identity shortcut
    ]

    for (n, cin, h, w, cout, stride) in configs:
        key, kx, kp = jax.random.split(key, 3)
        x = jax.random.normal(kx, (n, cin, h, w), jnp.float32)
        proj = (stride != 1 or cin != cout)
        params = make_params(kp, cin, cout, proj)

        fwd = jax.jit(functools.partial(basic_block_forward, stride=stride))
        out = jax.block_until_ready(fwd(x, params))

        ho = (h - 1) // stride + 1
        wo = (w - 1) // stride + 1
        assert out.shape == (n, cout, ho, wo), out.shape

        ref = _ref_forward(x, params, stride)
        # bf16 MXU operands + bf16 intermediates (f32 accumulation & BN math)
        # vs the f32 reference: tolerance covers the extra bf16 rounding steps.
        if not bool(jnp.allclose(out, ref, atol=3e-2, rtol=3e-2)):
            err = float(jnp.max(jnp.abs(out - ref)))
            raise AssertionError(
                f"Pallas BasicBlock mismatch (max abs err {err}) "
                f"for config {(n, cin, h, w, cout, stride)}")

    print("KERNEL_OK")
</pallas_src>

<mosaic_0001>
module attributes {stable_mosaic.version = 11 : i64} {
  func.func @k(%arg0: i32, %arg1: memref<8x128xf32, #tpu.memory_space<vmem>>, %arg2: memref<8x128xf32, #tpu.memory_space<vmem>>) attributes {dimension_semantics = [#tpu.dimension_semantics<arbitrary>], iteration_bounds = array<i64: 2>, scalar_prefetch = 0 : i64, scratch_operands = 0 : i64, tpu.core_type = #tpu.core_type<tc>, window_params = [{pipeline_mode = #tpu.pipeline_mode<synchronous>, transform_indices = @transform_0, window_bounds = array<i64: 8, 128>}, {transform_indices = @transform_1, window_bounds = array<i64: 8, 128>}]} {
    %c0 = arith.constant 0 : index
    %c0_0 = arith.constant 0 : index
    %0 = vector.load %arg1[%c0, %c0_0] : memref<8x128xf32, #tpu.memory_space<vmem>>, vector<8x128xf32>
    %cst = arith.constant 1.000000e+00 : f32
    %1 = vector.broadcast %cst : f32 to vector<8x128xf32>
    %2 = arith.addf %0, %1 : vector<8x128xf32>
    %c0_1 = arith.constant 0 : index
    %c0_2 = arith.constant 0 : index
    %3 = vector.load %arg2[%c0_1, %c0_2] : memref<8x128xf32, #tpu.memory_space<vmem>>, vector<8x128xf32>
    tpu.vector_store %arg2[%c0_1, %c0_2], %2 {strides = array<i32>} : memref<8x128xf32, #tpu.memory_space<vmem>>, vector<8x128xf32>,
    return
  }
  func.func @transform_0(%arg0: i32) -> (i32, i32) {
    %c0_i32 = arith.constant 0 : i32
    %c0_i32_0 = arith.constant 0 : i32
    %c0_i32_1 = arith.constant 0 : i32
    return %c0_i32, %c0_i32_0 : i32, i32
  }
  func.func @transform_1(%arg0: i32) -> (i32, i32) {
    %c0_i32 = arith.constant 0 : i32
    %c0_i32_0 = arith.constant 0 : i32
    return %arg0, %c0_i32 : i32, i32
  }
}

module attributes {stable_mosaic.version = 11 : i64} {
  func.func @_bn_relu_kernel(%arg0: i32, %arg1: memref<128x128xbf16, #tpu.memory_space<vmem>>, %arg2: memref<1x128xf32, #tpu.memory_space<vmem>>, %arg3: memref<1x128xf32, #tpu.memory_space<vmem>>, %arg4: memref<128x128xbf16, #tpu.memory_space<vmem>>) attributes {dimension_semantics = [#tpu.dimension_semantics<parallel>], iteration_bounds = array<i64: 1>, scalar_prefetch = 0 : i64, scratch_operands = 0 : i64, tpu.core_type = #tpu.core_type<tc>, window_params = [{transform_indices = @transform_0, window_bounds = array<i64: 128, 128>}, {pipeline_mode = #tpu.pipeline_mode<synchronous>, transform_indices = @transform_1, window_bounds = array<i64: 1, 128>}, {pipeline_mode = #tpu.pipeline_mode<synchronous>, transform_indices = @transform_2, window_bounds = array<i64: 1, 128>}, {transform_indices = @transform_3, window_bounds = array<i64: 128, 128>}]} {
    %c0 = arith.constant 0 : index
    %c0_0 = arith.constant 0 : index
    %0 = vector.load %arg1[%c0, %c0_0] : memref<128x128xbf16, #tpu.memory_space<vmem>>, vector<128x128xbf16>
    %1 = arith.extf %0 : vector<128x128xbf16> to vector<128x128xf32>
    %c0_1 = arith.constant 0 : index
    %c0_2 = arith.constant 0 : index
    %2 = vector.load %arg2[%c0_1, %c0_2] : memref<1x128xf32, #tpu.memory_space<vmem>>, vector<1x128xf32>
    %3 = vector.broadcast %2 : vector<1x128xf32> to vector<128x128xf32>
    %4 = arith.mulf %1, %3 : vector<128x128xf32>
    %c0_3 = arith.constant 0 : index
    %c0_4 = arith.constant 0 : index
    %5 = vector.load %arg3[%c0_3, %c0_4] : memref<1x128xf32, #tpu.memory_space<vmem>>, vector<1x128xf32>
    %6 = vector.broadcast %5 : vector<1x128xf32> to vector<128x128xf32>
    %7 = arith.addf %4, %6 : vector<128x128xf32>
    %cst = arith.constant 0.000000e+00 : f32
    %8 = vector.broadcast %cst : f32 to vector<128x128xf32>
    %9 = arith.maximumf %7, %8 : vector<128x128xf32>
    %10 = arith.truncf %9 : vector<128x128xf32> to vector<128x128xbf16>
    %c0_5 = arith.constant 0 : index
    %c0_6 = arith.constant 0 : index
    %11 = vector.load %arg4[%c0_5, %c0_6] : memref<128x128xbf16, #tpu.memory_space<vmem>>, vector<128x128xbf16>
    tpu.vector_store %arg4[%c0_5, %c0_6], %10 {strides = array<i32>} : memref<128x128xbf16, #tpu.memory_space<vmem>>, vector<128x128xbf16>,
    return
  }
  func.func @transform_0(%arg0: i32) -> (i32, i32) {
    %c0_i32 = arith.constant 0 : i32
    %c0_i32_0 = arith.constant 0 : i32
    return %arg0, %c0_i32 : i32, i32
  }
  func.func @transform_1(%arg0: i32) -> (i32, i32) {
    %c0_i32 = arith.constant 0 : i32
    %c0_i32_0 = arith.constant 0 : i32
    %c0_i32_1 = arith.constant 0 : i32
    return %c0_i32, %c0_i32_0 : i32, i32
  }
  func.func @transform_2(%arg0: i32) -> (i32, i32) {
    %c0_i32 = arith.constant 0 : i32
    %c0_i32_0 = arith.constant 0 : i32
    %c0_i32_1 = arith.constant 0 : i32
    return %c0_i32, %c0_i32_0 : i32, i32
  }
  func.func @transform_3(%arg0: i32) -> (i32, i32) {
    %c0_i32 = arith.constant 0 : i32
    %c0_i32_0 = arith.constant 0 : i32
    return %arg0, %c0_i32 : i32, i32
  }
}

module attributes {stable_mosaic.version = 11 : i64} {
  func.func @_conv_stats_kernel(%arg0: i32, %arg1: memref<128x36xbf16, #tpu.memory_space<vmem>>, %arg2: memref<36x128xbf16, #tpu.memory_space<vmem>>, %arg3: memref<128x128xbf16, #tpu.memory_space<vmem>>, %arg4: memref<1x1x128xf32, #tpu.memory_space<vmem>>, %arg5: memref<1x1x128xf32, #tpu.memory_space<vmem>>) attributes {dimension_semantics = [#tpu.dimension_semantics<parallel>], iteration_bounds = array<i64: 1>, scalar_prefetch = 0 : i64, scratch_operands = 0 : i64, tpu.core_type = #tpu.core_type<tc>, window_params = [{transform_indices = @transform_0, window_bounds = array<i64: 128, 36>}, {pipeline_mode = #tpu.pipeline_mode<synchronous>, transform_indices = @transform_1, window_bounds = array<i64: 36, 128>}, {transform_indices = @transform_2, window_bounds = array<i64: 128, 128>}, {transform_indices = @transform_3, window_bounds = array<i64: 1, 1, 128>}, {transform_indices = @transform_4, window_bounds = array<i64: 1, 1, 128>}]} {
    %c0 = arith.constant 0 : index
    %c0_0 = arith.constant 0 : index
    %0 = vector.load %arg1[%c0, %c0_0] : memref<128x36xbf16, #tpu.memory_space<vmem>>, vector<128x36xbf16>
    %c0_1 = arith.constant 0 : index
    %c0_2 = arith.constant 0 : index
    %1 = vector.load %arg2[%c0_1, %c0_2] : memref<36x128xbf16, #tpu.memory_space<vmem>>, vector<36x128xbf16>
    %cst = arith.constant dense<0.000000e+00> : vector<128x128xf32>
    %2 = tpu.matmul %0, %1, %cst {dimension_numbers = #tpu.dot_dimension_numbers<[1], [0], [0], [1], [0, 0, 1, 1], [], []>} : vector<128x36xbf16>, vector<36x128xbf16>, vector<128x128xf32> -> vector<128x128xf32>
    %3 = arith.truncf %2 : vector<128x128xf32> to vector<128x128xbf16>
    %c0_3 = arith.constant 0 : index
    %c0_4 = arith.constant 0 : index
    %4 = vector.load %arg3[%c0_3, %c0_4] : memref<128x128xbf16, #tpu.memory_space<vmem>>, vector<128x128xbf16>
    tpu.vector_store %arg3[%c0_3, %c0_4], %3 {strides = array<i32>} : memref<128x128xbf16, #tpu.memory_space<vmem>>, vector<128x128xbf16>,
    %cst_5 = arith.constant dense<0.000000e+00> : vector<128xf32>
    %5 = vector.multi_reduction <add>, %2, %cst_5 [0] : vector<128x128xf32> to vector<128xf32>
    %6 = vector.shape_cast %5 : vector<128xf32> to vector<1x128xf32>
    %7 = vector.shape_cast %6 : vector<1x128xf32> to vector<1x1x128xf32>
    %c0_6 = arith.constant 0 : index
    %c0_7 = arith.constant 0 : index
    %c0_8 = arith.constant 0 : index
    %8 = vector.load %arg4[%c0_6, %c0_7, %c0_8] : memref<1x1x128xf32, #tpu.memory_space<vmem>>, vector<1x1x128xf32>
    tpu.vector_store %arg4[%c0_6, %c0_7, %c0_8], %7 {strides = array<i32>} : memref<1x1x128xf32, #tpu.memory_space<vmem>>, vector<1x1x128xf32>,
    %9 = arith.mulf %2, %2 : vector<128x128xf32>
    %cst_9 = arith.constant dense<0.000000e+00> : vector<128xf32>
    %10 = vector.multi_reduction <add>, %9, %cst_9 [0] : vector<128x128xf32> to vector<128xf32>
    %11 = vector.shape_cast %10 : vector<128xf32> to vector<1x128xf32>
    %12 = vector.shape_cast %11 : vector<1x128xf32> to vector<1x1x128xf32>
    %c0_10 = arith.constant 0 : index
    %c0_11 = arith.constant 0 : index
    %c0_12 = arith.constant 0 : index
    %13 = vector.load %arg5[%c0_10, %c0_11, %c0_12] : memref<1x1x128xf32, #tpu.memory_space<vmem>>, vector<1x1x128xf32>
    tpu.vector_store %arg5[%c0_10, %c0_11, %c0_12], %12 {strides = array<i32>} : memref<1x1x128xf32, #tpu.memory_space<vmem>>, vector<1x1x128xf32>,
    return
  }
  func.func @transform_0(%arg0: i32) -> (i32, i32) {
    %c0_i32 = arith.constant 0 : i32
    %c0_i32_0 = arith.constant 0 : i32
    return %arg0, %c0_i32 : i32, i32
  }
  func.func @transform_1(%arg0: i32) -> (i32, i32) {
    %c0_i32 = arith.constant 0 : i32
    %c0_i32_0 = arith.constant 0 : i32
    %c0_i32_1 = arith.constant 0 : i32
    return %c0_i32, %c0_i32_0 : i32, i32
  }
  func.func @transform_2(%arg0: i32) -> (i32, i32) {
    %c0_i32 = arith.constant 0 : i32
    %c0_i32_0 = arith.constant 0 : i32
    return %arg0, %c0_i32 : i32, i32
  }
  func.func @transform_3(%arg0: i32) -> (i32, i32, i32) {
    %c0_i32 = arith.constant 0 : i32
    %c0_i32_0 = arith.constant 0 : i32
    %c0_i32_1 = arith.constant 0 : i32
    return %arg0, %c0_i32, %c0_i32_0 : i32, i32, i32
  }
  func.func @transform_4(%arg0: i32) -> (i32, i32, i32) {
    %c0_i32 = arith.constant 0 : i32
    %c0_i32_0 = arith.constant 0 : i32
    %c0_i32_1 = arith.constant 0 : i32
    return %arg0, %c0_i32, %c0_i32_0 : i32, i32, i32
  }
}

module attributes {stable_mosaic.version = 11 : i64} {
  func.func @_bn_add_relu_proj_kernel(%arg0: i32, %arg1: memref<128x128xbf16, #tpu.memory_space<vmem>>, %arg2: memref<1x128xf32, #tpu.memory_space<vmem>>, %arg3: memref<1x128xf32, #tpu.memory_space<vmem>>, %arg4: memref<128x128xbf16, #tpu.memory_space<vmem>>, %arg5: memref<1x128xf32, #tpu.memory_space<vmem>>, %arg6: memref<1x128xf32, #tpu.memory_space<vmem>>, %arg7: memref<128x128xbf16, #tpu.memory_space<vmem>>) attributes {dimension_semantics = [#tpu.dimension_semantics<parallel>], iteration_bounds = array<i64: 1>, scalar_prefetch = 0 : i64, scratch_operands = 0 : i64, tpu.core_type = #tpu.core_type<tc>, window_params = [{transform_indices = @transform_0, window_bounds = array<i64: 128, 128>}, {pipeline_mode = #tpu.pipeline_mode<synchronous>, transform_indices = @transform_1, window_bounds = array<i64: 1, 128>}, {pipeline_mode = #tpu.pipeline_mode<synchronous>, transform_indices = @transform_2, window_bounds = array<i64: 1, 128>}, {transform_indices = @transform_3, window_bounds = array<i64: 128, 128>}, {pipeline_mode = #tpu.pipeline_mode<synchronous>, transform_indices = @transform_4, window_bounds = array<i64: 1, 128>}, {pipeline_mode = #tpu.pipeline_mode<synchronous>, transform_indices = @transform_5, window_bounds = array<i64: 1, 128>}, {transform_indices = @transform_6, window_bounds = array<i64: 128, 128>}]} {
    %c0 = arith.constant 0 : index
    %c0_0 = arith.constant 0 : index
    %0 = vector.load %arg1[%c0, %c0_0] : memref<128x128xbf16, #tpu.memory_space<vmem>>, vector<128x128xbf16>
    %1 = arith.extf %0 : vector<128x128xbf16> to vector<128x128xf32>
    %c0_1 = arith.constant 0 : index
    %c0_2 = arith.constant 0 : index
    %2 = vector.load %arg2[%c0_1, %c0_2] : memref<1x128xf32, #tpu.memory_space<vmem>>, vector<1x128xf32>
    %3 = vector.broadcast %2 : vector<1x128xf32> to vector<128x128xf32>
    %4 = arith.mulf %1, %3 : vector<128x128xf32>
    %c0_3 = arith.constant 0 : index
    %c0_4 = arith.constant 0 : index
    %5 = vector.load %arg3[%c0_3, %c0_4] : memref<1x128xf32, #tpu.memory_space<vmem>>, vector<1x128xf32>
    %6 = vector.broadcast %5 : vector<1x128xf32> to vector<128x128xf32>
    %7 = arith.addf %4, %6 : vector<128x128xf32>
    %c0_5 = arith.constant 0 : index
    %c0_6 = arith.constant 0 : index
    %8 = vector.load %arg4[%c0_5, %c0_6] : memref<128x128xbf16, #tpu.memory_space<vmem>>, vector<128x128xbf16>
    %9 = arith.extf %8 : vector<128x128xbf16> to vector<128x128xf32>
    %c0_7 = arith.constant 0 : index
    %c0_8 = arith.constant 0 : index
    %10 = vector.load %arg5[%c0_7, %c0_8] : memref<1x128xf32, #tpu.memory_space<vmem>>, vector<1x128xf32>
    %11 = vector.broadcast %10 : vector<1x128xf32> to vector<128x128xf32>
    %12 = arith.mulf %9, %11 : vector<128x128xf32>
    %c0_9 = arith.constant 0 : index
    %c0_10 = arith.constant 0 : index
    %13 = vector.load %arg6[%c0_9, %c0_10] : memref<1x128xf32, #tpu.memory_space<vmem>>, vector<1x128xf32>
    %14 = vector.broadcast %13 : vector<1x128xf32> to vector<128x128xf32>
    %15 = arith.addf %12, %14 : vector<128x128xf32>
    %16 = arith.addf %7, %15 : vector<128x128xf32>
    %cst = arith.constant 0.000000e+00 : f32
    %17 = vector.broadcast %cst : f32 to vector<128x128xf32>
    %18 = arith.maximumf %16, %17 : vector<128x128xf32>
    %19 = arith.truncf %18 : vector<128x128xf32> to vector<128x128xbf16>
    %c0_11 = arith.constant 0 : index
    %c0_12 = arith.constant 0 : index
    %20 = vector.load %arg7[%c0_11, %c0_12] : memref<128x128xbf16, #tpu.memory_space<vmem>>, vector<128x128xbf16>
    tpu.vector_store %arg7[%c0_11, %c0_12], %19 {strides = array<i32>} : memref<128x128xbf16, #tpu.memory_space<vmem>>, vector<128x128xbf16>,
    return
  }
  func.func @transform_0(%arg0: i32) -> (i32, i32) {
    %c0_i32 = arith.constant 0 : i32
    %c0_i32_0 = arith.constant 0 : i32
    return %arg0, %c0_i32 : i32, i32
  }
  func.func @transform_1(%arg0: i32) -> (i32, i32) {
    %c0_i32 = arith.constant 0 : i32
    %c0_i32_0 = arith.constant 0 : i32
    %c0_i32_1 = arith.constant 0 : i32
    return %c0_i32, %c0_i32_0 : i32, i32
  }
  func.func @transform_2(%arg0: i32) -> (i32, i32) {
    %c0_i32 = arith.constant 0 : i32
    %c0_i32_0 = arith.constant 0 : i32
    %c0_i32_1 = arith.constant 0 : i32
    return %c0_i32, %c0_i32_0 : i32, i32
  }
  func.func @transform_3(%arg0: i32) -> (i32, i32) {
    %c0_i32 = arith.constant 0 : i32
    %c0_i32_0 = arith.constant 0 : i32
    return %arg0, %c0_i32 : i32, i32
  }
  func.func @transform_4(%arg0: i32) -> (i32, i32) {
    %c0_i32 = arith.constant 0 : i32
    %c0_i32_0 = arith.constant 0 : i32
    %c0_i32_1 = arith.constant 0 : i32
    return %c0_i32, %c0_i32_0 : i32, i32
  }
  func.func @transform_5(%arg0: i32) -> (i32, i32) {
    %c0_i32 = arith.constant 0 : i32
    %c0_i32_0 = arith.constant 0 : i32
    %c0_i32_1 = arith.constant 0 : i32
    return %c0_i32, %c0_i32_0 : i32, i32
  }
  func.func @transform_6(%arg0: i32) -> (i32, i32) {
    %c0_i32 = arith.constant 0 : i32
    %c0_i32_0 = arith.constant 0 : i32
    return %arg0, %c0_i32 : i32, i32
  }
}

module attributes {stable_mosaic.version = 11 : i64} {
  func.func @_conv_stats_proj_kernel(%arg0: i32, %arg1: memref<128x72xbf16, #tpu.memory_space<vmem>>, %arg2: memref<72x128xbf16, #tpu.memory_space<vmem>>, %arg3: memref<128x4xbf16, #tpu.memory_space<vmem>>, %arg4: memref<4x128xbf16, #tpu.memory_space<vmem>>, %arg5: memref<128x128xbf16, #tpu.memory_space<vmem>>, %arg6: memref<128x128xbf16, #tpu.memory_space<vmem>>, %arg7: memref<1x1x128xf32, #tpu.memory_space<vmem>>, %arg8: memref<1x1x128xf32, #tpu.memory_space<vmem>>, %arg9: memref<1x1x128xf32, #tpu.memory_space<vmem>>, %arg10: memref<1x1x128xf32, #tpu.memory_space<vmem>>) attributes {dimension_semantics = [#tpu.dimension_semantics<parallel>], iteration_bounds = array<i64: 1>, scalar_prefetch = 0 : i64, scratch_operands = 0 : i64, tpu.core_type = #tpu.core_type<tc>, window_params = [{transform_indices = @transform_0, window_bounds = array<i64: 128, 72>}, {pipeline_mode = #tpu.pipeline_mode<synchronous>, transform_indices = @transform_1, window_bounds = array<i64: 72, 128>}, {transform_indices = @transform_2, window_bounds = array<i64: 128, 4>}, {pipeline_mode = #tpu.pipeline_mode<synchronous>, transform_indices = @transform_3, window_bounds = array<i64: 4, 128>}, {transform_indices = @transform_4, window_bounds = array<i64: 128, 128>}, {transform_indices = @transform_5, window_bounds = array<i64: 128, 128>}, {transform_indices = @transform_6, window_bounds = array<i64: 1, 1, 128>}, {transform_indices = @transform_7, window_bounds = array<i64: 1, 1, 128>}, {transform_indices = @transform_8, window_bounds = array<i64: 1, 1, 128>}, {transform_indices = @transform_9, window_bounds = array<i64: 1, 1, 128>}]} {
    %c0 = arith.constant 0 : index
    %c0_0 = arith.constant 0 : index
    %0 = vector.load %arg1[%c0, %c0_0] : memref<128x72xbf16, #tpu.memory_space<vmem>>, vector<128x72xbf16>
    %c0_1 = arith.constant 0 : index
    %c0_2 = arith.constant 0 : index
    %1 = vector.load %arg2[%c0_1, %c0_2] : memref<72x128xbf16, #tpu.memory_space<vmem>>, vector<72x128xbf16>
    %cst = arith.constant dense<0.000000e+00> : vector<128x128xf32>
    %2 = tpu.matmul %0, %1, %cst {dimension_numbers = #tpu.dot_dimension_numbers<[1], [0], [0], [1], [0, 0, 1, 1], [], []>} : vector<128x72xbf16>, vector<72x128xbf16>, vector<128x128xf32> -> vector<128x128xf32>
    %c0_3 = arith.constant 0 : index
    %c0_4 = arith.constant 0 : index
    %3 = vector.load %arg3[%c0_3, %c0_4] : memref<128x4xbf16, #tpu.memory_space<vmem>>, vector<128x4xbf16>
    %c0_5 = arith.constant 0 : index
    %c0_6 = arith.constant 0 : index
    %4 = vector.load %arg4[%c0_5, %c0_6] : memref<4x128xbf16, #tpu.memory_space<vmem>>, vector<4x128xbf16>
    %cst_7 = arith.constant dense<0.000000e+00> : vector<128x128xf32>
    %5 = tpu.matmul %3, %4, %cst_7 {dimension_numbers = #tpu.dot_dimension_numbers<[1], [0], [0], [1], [0, 0, 1, 1], [], []>} : vector<128x4xbf16>, vector<4x128xbf16>, vector<128x128xf32> -> vector<128x128xf32>
    %6 = arith.truncf %2 : vector<128x128xf32> to vector<128x128xbf16>
    %c0_8 = arith.constant 0 : index
    %c0_9 = arith.constant 0 : index
    %7 = vector.load %arg5[%c0_8, %c0_9] : memref<128x128xbf16, #tpu.memory_space<vmem>>, vector<128x128xbf16>
    tpu.vector_store %arg5[%c0_8, %c0_9], %6 {strides = array<i32>} : memref<128x128xbf16, #tpu.memory_space<vmem>>, vector<128x128xbf16>,
    %8 = arith.truncf %5 : vector<128x128xf32> to vector<128x128xbf16>
    %c0_10 = arith.constant 0 : index
    %c0_11 = arith.constant 0 : index
    %9 = vector.load %arg6[%c0_10, %c0_11] : memref<128x128xbf16, #tpu.memory_space<vmem>>, vector<128x128xbf16>
    tpu.vector_store %arg6[%c0_10, %c0_11], %8 {strides = array<i32>} : memref<128x128xbf16, #tpu.memory_space<vmem>>, vector<128x128xbf16>,
    %cst_12 = arith.constant dense<0.000000e+00> : vector<128xf32>
    %10 = vector.multi_reduction <add>, %2, %cst_12 [0] : vector<128x128xf32> to vector<128xf32>
    %11 = vector.shape_cast %10 : vector<128xf32> to vector<1x128xf32>
    %12 = vector.shape_cast %11 : vector<1x128xf32> to vector<1x1x128xf32>
    %c0_13 = arith.constant 0 : index
    %c0_14 = arith.constant 0 : index
    %c0_15 = arith.constant 0 : index
    %13 = vector.load %arg7[%c0_13, %c0_14, %c0_15] : memref<1x1x128xf32, #tpu.memory_space<vmem>>, vector<1x1x128xf32>
    tpu.vector_store %arg7[%c0_13, %c0_14, %c0_15], %12 {strides = array<i32>} : memref<1x1x128xf32, #tpu.memory_space<vmem>>, vector<1x1x128xf32>,
    %14 = arith.mulf %2, %2 : vector<128x128xf32>
    %cst_16 = arith.constant dense<0.000000e+00> : vector<128xf32>
    %15 = vector.multi_reduction <add>, %14, %cst_16 [0] : vector<128x128xf32> to vector<128xf32>
    %16 = vector.shape_cast %15 : vector<128xf32> to vector<1x128xf32>
    %17 = vector.shape_cast %16 : vector<1x128xf32> to vector<1x1x128xf32>
    %c0_17 = arith.constant 0 : index
    %c0_18 = arith.constant 0 : index
    %c0_19 = arith.constant 0 : index
    %18 = vector.load %arg8[%c0_17, %c0_18, %c0_19] : memref<1x1x128xf32, #tpu.memory_space<vmem>>, vector<1x1x128xf32>
    tpu.vector_store %arg8[%c0_17, %c0_18, %c0_19], %17 {strides = array<i32>} : memref<1x1x128xf32, #tpu.memory_space<vmem>>, vector<1x1x128xf32>,
    %cst_20 = arith.constant dense<0.000000e+00> : vector<128xf32>
    %19 = vector.multi_reduction <add>, %5, %cst_20 [0] : vector<128x128xf32> to vector<128xf32>
    %20 = vector.shape_cast %19 : vector<128xf32> to vector<1x128xf32>
    %21 = vector.shape_cast %20 : vector<1x128xf32> to vector<1x1x128xf32>
    %c0_21 = arith.constant 0 : index
    %c0_22 = arith.constant 0 : index
    %c0_23 = arith.constant 0 : index
    %22 = vector.load %arg9[%c0_21, %c0_22, %c0_23] : memref<1x1x128xf32, #tpu.memory_space<vmem>>, vector<1x1x128xf32>
    tpu.vector_store %arg9[%c0_21, %c0_22, %c0_23], %21 {strides = array<i32>} : memref<1x1x128xf32, #tpu.memory_space<vmem>>, vector<1x1x128xf32>,
    %23 = arith.mulf %5, %5 : vector<128x128xf32>
    %cst_24 = arith.constant dense<0.000000e+00> : vector<128xf32>
    %24 = vector.multi_reduction <add>, %23, %cst_24 [0] : vector<128x128xf32> to vector<128xf32>
    %25 = vector.shape_cast %24 : vector<128xf32> to vector<1x128xf32>
    %26 = vector.shape_cast %25 : vector<1x128xf32> to vector<1x1x128xf32>
    %c0_25 = arith.constant 0 : index
    %c0_26 = arith.constant 0 : index
    %c0_27 = arith.constant 0 : index
    %27 = vector.load %arg10[%c0_25, %c0_26, %c0_27] : memref<1x1x128xf32, #tpu.memory_space<vmem>>, vector<1x1x128xf32>
    tpu.vector_store %arg10[%c0_25, %c0_26, %c0_27], %26 {strides = array<i32>} : memref<1x1x128xf32, #tpu.memory_space<vmem>>, vector<1x1x128xf32>,
    return
  }
  func.func @transform_0(%arg0: i32) -> (i32, i32) {
    %c0_i32 = arith.constant 0 : i32
    %c0_i32_0 = arith.constant 0 : i32
    return %arg0, %c0_i32 : i32, i32
  }
  func.func @transform_1(%arg0: i32) -> (i32, i32) {
    %c0_i32 = arith.constant 0 : i32
    %c0_i32_0 = arith.constant 0 : i32
    %c0_i32_1 = arith.constant 0 : i32
    return %c0_i32, %c0_i32_0 : i32, i32
  }
  func.func @transform_2(%arg0: i32) -> (i32, i32) {
    %c0_i32 = arith.constant 0 : i32
    %c0_i32_0 = arith.constant 0 : i32
    return %arg0, %c0_i32 : i32, i32
  }
  func.func @transform_3(%arg0: i32) -> (i32, i32) {
    %c0_i32 = arith.constant 0 : i32
    %c0_i32_0 = arith.constant 0 : i32
    %c0_i32_1 = arith.constant 0 : i32
    return %c0_i32, %c0_i32_0 : i32, i32
  }
  func.func @transform_4(%arg0: i32) -> (i32, i32) {
    %c0_i32 = arith.constant 0 : i32
    %c0_i32_0 = arith.constant 0 : i32
    return %arg0, %c0_i32 : i32, i32
  }
  func.func @transform_5(%arg0: i32) -> (i32, i32) {
    %c0_i32 = arith.constant 0 : i32
    %c0_i32_0 = arith.constant 0 : i32
    return %arg0, %c0_i32 : i32, i32
  }
  func.func @transform_6(%arg0: i32) -> (i32, i32, i32) {
    %c0_i32 = arith.constant 0 : i32
    %c0_i32_0 = arith.constant 0 : i32
    %c0_i32_1 = arith.constant 0 : i32
    return %arg0, %c0_i32, %c0_i32_0 : i32, i32, i32
  }
  func.func @transform_7(%arg0: i32) -> (i32, i32, i32) {
    %c0_i32 = arith.constant 0 : i32
    %c0_i32_0 = arith.constant 0 : i32
    %c0_i32_1 = arith.constant 0 : i32
    return %arg0, %c0_i32, %c0_i32_0 : i32, i32, i32
  }
  func.func @transform_8(%arg0: i32) -> (i32, i32, i32) {
    %c0_i32 = arith.constant 0 : i32
    %c0_i32_0 = arith.constant 0 : i32
    %c0_i32_1 = arith.constant 0 : i32
    return %arg0, %c0_i32, %c0_i32_0 : i32, i32, i32
  }
  func.func @transform_9(%arg0: i32) -> (i32, i32, i32) {
    %c0_i32 = arith.constant 0 : i32
    %c0_i32_0 = arith.constant 0 : i32
    %c0_i32_1 = arith.constant 0 : i32
    return %arg0, %c0_i32, %c0_i32_0 : i32, i32, i32
  }
}

</mosaic_0001>

<bundles_post_ra>
// kernel: tpu_custom_call.1
= control target key start
LH: loop header
LB: loop body
LE: loop exit
PB: predicated region body
PF: predicated region fallthrough
CT: control target
= control target key end

     0   :  { %6 = vsyncpa [#allocation3], 0  ;;  %s482_s0 = inlined_call_operand.hbm [shape: f32[8,128], index: 0, kind: input, shape index: {}]   ;;  %s483_s1 = inlined_call_operand.hbm [shape: f32[16,128], index: 1, kind: output, shape index: {}]  }
   0x1   :  { %7 = vsyncpa [#allocation4], 0 }
   0x2   :  { %9 = vsyncpa [#allocation4 + $0x1], 0  ;;  %s352_s6 = smov 0   ;;  %s354_s7 = smov 0  }
   0x3   :  { %s356_s8 = smov 0   ;;  %s358_s9 = smov 0  }
   0x4 LB: > { %s373_s10 = sadd.s32 4294967295, %s338_s9   ;;  %s184_s11 = sadd.s32 4294967294, %s338_s9   ;;  %s338_s9 = sphi %s358_s9, %s499_s9   ;;  %s334_s8 = sphi %s356_s8, %s498_s8   ;;  %s330_s7 = sphi %s354_s7, %s497_s7   ;;  %s326_s6 = sphi %s352_s6, %s496_s6  }
   0x5   : > { %s377_s12 = sadd.s32 1, %s338_s9   ;;  %s43_s13 = sadd.s32 1, %s334_s8 }
   0x6   : > { %s40_s14 = ssub.s32 %s338_s9, %s377_s12  ;;  %p53_p0 = scmp.ne.s32.totalorder %s334_s8, %s330_s7 }
   0x7   : > { %p41_p1 = scmp.eq.s32.totalorder %s40_s14, 0  ;;  %p54_p2 = scmp.eq.s32.totalorder %s373_s10, 1 }
   0x8   : > { %p59_p3 = scmp.ne.s32.totalorder %s330_s7, %s326_s6  ;;  %p60_p4 = scmp.eq.s32.totalorder %s184_s11, 1 }
   0x9   : > { %s388_s15 = scalar_select %p41_p1, %s334_s8, %s43_s13  }
   0xa   : > { %p390_p5 = por %p54_p2, %p53_p0  ;;  %p394_p6 = por %p60_p4, %p59_p3 }
   0xb   : > { %p185_p7 = scmp.ge.s32.totalorder %s338_s9, 1  ;;  %p67_p8 = scmp.lt.s32.totalorder %s338_s9, 3 }
   0xc   : > { %s487_s16 = scalar_select %p390_p5, 1, 0 }
   0xd   : > { %s488_s17 = scalar_select %p394_p6, 1, 0 }
   0xe   : > { %p484_p9 = scmp.eq.s32.totalorder %s373_s10, 0  ;;  %p401_p10 = pnand %p185_p7, %p67_p8 }
   0xf   : > { %s340_s19 = smov [#allocation2]   ;;  %s244_s24 = scalar_lea.hbm %s482_s0, 128 }
  0x10   : > { %s489_s18 = scalar_select %p401_p10, 1, 0 }
  0x11   : > { %s80_s20 = sshll.u32 %s340_s19, 4  ;;  %p200_p11 = pneg %p401_p10  ;;  %s81_s20 = int_to_ptr.vmem [resolvable:$true] %s80_s20 }
  0x12   : > { %p245_p13 = scmp.ne.s32.totalorder %s482_s0, %s244_s24  ;;  %p251_p3 = scmp.lt.u32.totalorder %s244_s24, %s482_s0 }
  0x13   : > { %p409_p12 = pnand %p484_p9, %p200_p11 }
  0x15   : > { %p246_p0 = pneg %p409_p12 }
  0x17   : > { %p247_p1 = pnand %p246_p0, %p245_p13 }
  0x19   : > { %p248_p2 = pneg %p247_p1 }
  0x1b   : > { %p253_p4 = pnand %p251_p3, %p248_p2 }
  0x1d   : > { %256 = shalt.err (!%p253_p4)
}
  0x1e   : > { %s257_s29 = scalar_lea.vmem %s81_s20, 128  ;;  %p265_p9 = scmp.lt.s32.totalorder %s81_s20, %s81_s20 }
  0x1f   : > { %p258_p7 = scmp.ne.s32.totalorder %s81_s20, %s257_s29  ;;  %p266_p6 = scmp.lt.s32.totalorder %s257_s29, %s257_s29 }
  0x21   : > { %p260_p8 = pnand %p258_p7, %p246_p0  ;;  %p267_p5 = por %p266_p6, %p265_p9 }
  0x23   : > { %p261_p11 = pneg %p260_p8 }
  0x25   : > { %p268_p10 = pnand %p267_p5, %p261_p11 }
  0x27   : > { %271 = shalt.err (!%p268_p10)
}
  0x28   : > { %203 = dma.hbm_to_vmem [thread:$0]  (!%p409_p12), %s482_s0, 128, %s81_s20, [#allocation3]  }
  0x29   : > { %p491_p13 = scmp.ne.s32.totalorder %s489_s18, 0 }
  0x2a   : > { %p492_p1 = scmp.eq.s32.totalorder (!%p491_p13), %s373_s10, 0 }
  0x2b   : > { %93 = sbr.rel (%p491_p13) target bundleno = 77 (0x4d), region = 24 }
  0x32   : > { %317 = dma.done.wait (%p492_p1), [#allocation3], 128   ;;  %p493_p0 = pmov %p492_p1 }
  0x33   : > { %s105_s3 = sand.u32 1, %s330_s7   ;;  %s191_s13 = sshll.u32 %s373_s10, 7  ;;  %v108_v0 = vld [vmem:[#allocation2] sm:$0xff] }
  0x34   : > { %319 = vsyncadd (%p493_p0), [#allocation3], 4294967168  ;;  %s189_s4 = sshll.u32 %s105_s3, 3  ;;  %v109_v1 = vadd.f32 1.0, %v108_v0  ;;  %s442_s19 = scalar_lea.hbm %s483_s1, %s191_s13 }
  0x35   : > { %s107_s5 = scalar_lea.vmem [#allocation5], %s189_s4  ;;  %s112_s20 = scalar_lea.sflag [#allocation4], %s105_s3 }
  0x36   : > { %s125_s11 = sshll.u32 %s107_s5, 4  ;;  %110 = vst [vmem:[%s107_s5] sm:$0xff] %v109_v1  ;;  %p494_p6 = scmp.ne.s32.totalorder %s487_s16, 0  ;;  %s437_s11 = int_to_ptr.vmem [resolvable:$true] %s125_s11 }
  0x37   : > { %s272_s21 = scalar_lea.vmem %s437_s11, 128  ;;  %s341_s10 = smov [#allocation5]  }
  0x38   : > { %p273_p5 = scmp.ne.s32.totalorder %s437_s11, %s272_s21  ;;  %s276_s22 = sshll.u32 %s341_s10, 4  ;;  %s277_s22 = int_to_ptr.vmem [resolvable:$false] %s276_s22 }
  0x39   : > { %s278_s23 = scalar_lea.vmem %s277_s22, 256  ;;  %p279_p12 = scmp.lt.s32.totalorder %s437_s11, %s277_s22 }
  0x3a   : > { %p274_p9 = pnand %p273_p5, %p494_p6  ;;  %p280_p2 = scmp.lt.s32.totalorder %s278_s23, %s272_s21 }
  0x3c   : > { %p275_p10 = pneg %p274_p9  ;;  %p281_p3 = por %p280_p2, %p279_p12 }
  0x3e   : > { %p282_p4 = pnand %p281_p3, %p275_p10 }
  0x40   : > { %285 = shalt.err (!%p282_p4)
}
  0x41   : > { %s286_s24 = scalar_lea.hbm %s442_s19, 128  ;;  %s290_s27 = scalar_lea.hbm %s483_s1, 256 }
  0x42   : > { %p287_p7 = scmp.ne.s32.totalorder %s442_s19, %s286_s24  ;;  %p291_p13 = scmp.lt.u32.totalorder %s442_s19, %s483_s1 }
  0x43   : > { %p292_p1 = scmp.lt.u32.totalorder %s290_s27, %s286_s24  ;;  %p294_p5 = scmp.lt.u32.totalorder %s286_s24, %s442_s19 }
  0x44   : > { %p288_p8 = pnand %p287_p7, %p494_p6 }
  0x45   : > { %p293_p0 = por %p292_p1, %p291_p13 }
  0x46   : > { %p289_p11 = pneg %p288_p8 }
  0x47   : > { %p295_p9 = por %p294_p5, %p293_p0 }
  0x49   : > { %p296_p10 = pnand %p295_p9, %p289_p11 }
  0x4b   : > { %299 = shalt.err (!%p296_p10)
}
  0x4c   : > { %198 = dma.vmem_to_hbm [thread:$0]  (%p494_p6), %s437_s11, 128, %s442_s19, %s112_s20  }
  0x4d PF: > { %p210_p12 = scmp.ge.s32.totalorder %s338_s9, 2  ;;  %s137_s30 = sand.u32 1, %s326_s6  }
  0x4e   : > { %p495_p2 = scmp.ne.s32.totalorder %s488_s17, 0  ;;  %s138_s2 = scalar_lea.sflag [#allocation4], %s137_s30 }
  0x50   : > { %p205_p3 = pnand %p210_p12, %p495_p2 }
  0x52   : > { %321 = dma.done.wait (!%p205_p3), %s138_s2, 128  }
  0x53   : > { %323 = vsyncadd (!%p205_p3), %s138_s2, 4294967168  ;;  %p12_p4 = scmp.ge.s32.totalorder %s377_s12, 4   ;;  %s496_s6 = smov %s330_s7 }
  0x54   : > { %s497_s7 = smov %s334_s8  ;;  %s498_s8 = smov %s388_s15 }
  0x55   : > { %s499_s9 = smov %s377_s12  ;;  %14 = sbr.rel (!%p12_p4) target bundleno = 4 (0x4), region = 61 }
  0x5c   :  { %143 = vsyncpa [#allocation3], 1 }
  0x5d   :  { %145 = vsyncpa [#allocation3 + $0x1], 1 }
  0x5e   :  { %146 = vsyncpa [#allocation4], 1 }
  0x5f   :  { %148 = vsyncpa [#allocation4 + $0x1], 1 }

// kernel: basic_block_forward.5
= control target key start
LH: loop header
LB: loop body
LE: loop exit
PB: predicated region body
PF: predicated region fallthrough
CT: control target
= control target key end

     0   :  { %s422_s0 = inlined_call_operand.vmem [shape: bf16[128,128], index: 0, kind: input, shape index: {}]   ;;  %s423_s1 = inlined_call_operand.vmem [shape: f32[1,128], index: 1, kind: input, shape index: {}]   ;;  %s424_s2 = inlined_call_operand.vmem [shape: f32[1,128], index: 2, kind: input, shape index: {}]   ;;  %s425_s3 = inlined_call_operand.vmem [shape: bf16[128,128], index: 3, kind: output, shape index: {}]  }
   0x1   :  { %v227_v0 = vld [vmem:[%s422_s0] sm:$0xff]   ;;  %v298_v4 = vld [vmem:[%s422_s0 + $0x8] sm:$0xff]   ;;  %v299_v5 = vld [vmem:[%s422_s0 + $0x10] sm:$0xff]  }
   0x2   :  { %v338_v1 = vld [vmem:[%s423_s1] ss:$0 sm:$0xff]  ;;  %v228_v2 = vunpack.c.l.bf16 %v227_v0  ;;  %v229_v3 = vunpack.c.h.bf16 %v227_v0  ;;  %v300_v6 = vld [vmem:[%s422_s0 + $0x18] sm:$0xff]   ;;  %v232_v8 = vunpack.c.l.bf16 %v298_v4  ;;  %v233_v9 = vunpack.c.h.bf16 %v298_v4  ;;  %v302_v33 = vld [vmem:[%s422_s0 + $0x28] sm:$0xff]  }
   0x3   :  { %v352_v7 = vld [vmem:[%s424_s2] ss:$0 sm:$0xff]  ;;  %v236_v10 = vunpack.c.l.bf16 %v299_v5  ;;  %v237_v11 = vunpack.c.h.bf16 %v299_v5  ;;  %v240_v14 = vunpack.c.l.bf16 %v300_v6  ;;  %v241_v15 = vunpack.c.h.bf16 %v300_v6  ;;  %v303_v38 = vld [vmem:[%s422_s0 + $0x30] sm:$0xff]   ;;  %v304_v43 = vld [vmem:[%s422_s0 + $0x38] sm:$0xff]  }
   0x4   :  { %v53_v12 = vmul.f32 %v228_v2, %v338_v1  ;;  %v54_v13 = vmul.f32 %v229_v3, %v338_v1  ;;  %v55_v16 = vmul.f32 %v232_v8, %v338_v1  ;;  %v56_v17 = vmul.f32 %v233_v9, %v338_v1  ;;  %v301_v28 = vld [vmem:[%s422_s0 + $0x20] sm:$0xff]  }
   0x5   :  { %v57_v18 = vmul.f32 %v236_v10, %v338_v1  ;;  %v58_v19 = vmul.f32 %v237_v11, %v338_v1  ;;  %v59_v22 = vmul.f32 %v240_v14, %v338_v1  ;;  %v60_v23 = vmul.f32 %v241_v15, %v338_v1 }
   0x6   :  { %v76_v20 = vadd.f32 %v352_v7, %v53_v12  ;;  %v77_v21 = vadd.f32 %v352_v7, %v54_v13  ;;  %v78_v24 = vadd.f32 %v352_v7, %v55_v16  ;;  %v79_v25 = vadd.f32 %v352_v7, %v56_v17 }
   0x7   :  { %v80_v26 = vadd.f32 %v352_v7, %v57_v18  ;;  %v81_v27 = vadd.f32 %v352_v7, %v58_v19  ;;  %v82_v31 = vadd.f32 %v352_v7, %v59_v22  ;;  %v83_v32 = vadd.f32 %v352_v7, %v60_v23 }
   0x8   :  { %v92_v29 = vmax.f32 %v76_v20, 0.0  ;;  %v93_v30 = vmax.f32 %v77_v21, 0.0  ;;  %v94_v34 = vmax.f32 %v78_v24, 0.0  ;;  %v95_v35 = vmax.f32 %v79_v25, 0.0 }
   0x9   :  { %v96_v36 = vmax.f32 %v80_v26, 0.0  ;;  %v97_v37 = vmax.f32 %v81_v27, 0.0  ;;  %v98_v40 = vmax.f32 %v82_v31, 0.0  ;;  %v99_v41 = vmax.f32 %v83_v32, 0.0 }
   0xa   :  { %v261_v39 = vpack.c.bf16 %v93_v30, %v92_v29  ;;  %v244_v42 = vunpack.c.l.bf16 %v301_v28  ;;  %v266_v44 = vpack.c.bf16 %v95_v35, %v94_v34  ;;  %v245_v46 = vunpack.c.h.bf16 %v301_v28 }
   0xb   :  { %v271_v45 = vpack.c.bf16 %v97_v37, %v96_v36  ;;  %v248_v47 = vunpack.c.l.bf16 %v302_v33  ;;  %v276_v48 = vpack.c.bf16 %v99_v41, %v98_v40  ;;  %v249_v50 = vunpack.c.h.bf16 %v302_v33 }
   0xc   :  { %262 = vst [vmem:[%s425_s3] sm:$0xff] %v261_v39   ;;  %v61_v49 = vmul.f32 %v244_v42, %v338_v1  ;;  %v252_v51 = vunpack.c.l.bf16 %v303_v38  ;;  %305 = vst [vmem:[%s425_s3 + $0x8] sm:$0xff] %v266_v44   ;;  %v62_v52 = vmul.f32 %v245_v46, %v338_v1  ;;  %v253_v54 = vunpack.c.h.bf16 %v303_v38 }
   0xd   :  { %306 = vst [vmem:[%s425_s3 + $0x10] sm:$0xff] %v271_v45   ;;  %v63_v53 = vmul.f32 %v248_v47, %v338_v1  ;;  %v256_v55 = vunpack.c.l.bf16 %v304_v43  ;;  %307 = vst [vmem:[%s425_s3 + $0x18] sm:$0xff] %v276_v48   ;;  %v64_v57 = vmul.f32 %v249_v50, %v338_v1  ;;  %v257_v59 = vunpack.c.h.bf16 %v304_v43 }
   0xe   :  { %v84_v56 = vadd.f32 %v352_v7, %v61_v49  ;;  %v65_v58 = vmul.f32 %v252_v51, %v338_v1  ;;  %v85_v60 = vadd.f32 %v352_v7, %v62_v52  ;;  %v66_v62 = vmul.f32 %v253_v54, %v338_v1 }
   0xf   :  { %v86_v61 = vadd.f32 %v352_v7, %v63_v53  ;;  %v67_v63 = vmul.f32 %v256_v55, %v338_v1  ;;  %v87_v2 = vadd.f32 %v352_v7, %v64_v57  ;;  %v68_v4 = vmul.f32 %v257_v59, %v338_v1 }
  0x10   :  { %v100_v0 = vmax.f32 %v84_v56, 0.0  ;;  %v88_v3 = vadd.f32 %v352_v7, %v65_v58  ;;  %v101_v5 = vmax.f32 %v85_v60, 0.0  ;;  %v89_v8 = vadd.f32 %v352_v7, %v66_v62 }
  0x11   :  { %v102_v6 = vmax.f32 %v86_v61, 0.0  ;;  %v90_v9 = vadd.f32 %v352_v7, %v67_v63  ;;  %v103_v10 = vmax.f32 %v87_v2, 0.0  ;;  %v91_v12 = vadd.f32 %v352_v7, %v68_v4 }
  0x12   :  { %v104_v11 = vmax.f32 %v88_v3, 0.0  ;;  %v281_v13 = vpack.c.bf16 %v101_v5, %v100_v0  ;;  %v105_v14 = vmax.f32 %v89_v8, 0.0 }
  0x13   :  { %v106_v15 = vmax.f32 %v90_v9, 0.0  ;;  %v286_v16 = vpack.c.bf16 %v103_v10, %v102_v6  ;;  %v107_v17 = vmax.f32 %v91_v12, 0.0 }
  0x14   :  { %308 = vst [vmem:[%s425_s3 + $0x20] sm:$0xff] %v281_v13   ;;  %v291_v1 = vpack.c.bf16 %v105_v14, %v104_v11 }
  0x15   :  { %309 = vst [vmem:[%s425_s3 + $0x28] sm:$0xff] %v286_v16   ;;  %v296_v18 = vpack.c.bf16 %v107_v17, %v106_v15 }
  0x16   :  { %310 = vst [vmem:[%s425_s3 + $0x30] sm:$0xff] %v291_v1  }
  0x17   :  { %311 = vst [vmem:[%s425_s3 + $0x38] sm:$0xff] %v296_v18  }

// kernel: basic_block_forward.4
= control target key start
LH: loop header
LB: loop body
LE: loop exit
PB: predicated region body
PF: predicated region fallthrough
CT: control target
= control target key end

     0   :  { %vm91_vm0 = vcmask 293888   ;;  %vm116_vm1 = vcmask 1041408   ;;  %s615_s1 = inlined_call_operand.vmem [shape: bf16[36,128], index: 1, kind: input, shape index: {}]   ;;  %s616_s0 = inlined_call_operand.vmem [shape: bf16[128,36], index: 0, kind: input, shape index: {}]   ;;  %s617_s2 = inlined_call_operand.vmem [shape: bf16[128,128], index: 2, kind: output, shape index: {0}]   ;;  %s618_s3 = inlined_call_operand.vmem [shape: f32[1,1,128], index: 3, kind: output, shape index: {1}]   ;;  %s619_s4 = inlined_call_operand.vmem [shape: f32[1,1,128], index: 4, kind: output, shape index: {2}]  }
   0x1   :  { %v508_v0 = vld [vmem:[%s615_s1] sm:$0xff]   ;;  %v509_v1 = vld [vmem:[%s615_s1 + $0x8] sm:$0xff]   ;;  %v510_v2 = vld [vmem:[%s615_s1 + $0x10] ss:$0 sps:$4 sm:$0x33]  }
   0x2   :  { %478 = vmatprep.subr.bf16.mxu0 %v508_v0  ;;  %v511_v3 = vld [vmem:[%s616_s0] sm:$0xff]   ;;  %500 = vmatprep.subr.bf16.mxu1 %v508_v0  ;;  %v118_v5 = vsel %vm116_vm1, %v510_v2, 0  ;;  %v512_v6 = vld [vmem:[%s616_s0 + $0x8] sm:$0xff]   ;;  %v513_v8 = vld [vmem:[%s616_s0 + $0x10] sm:$0xff]  }
   0x3   :  { %479 = vmatpush3.bf16.msra.mxu0 %v508_v0  ;;  %503 = vmatpush3.bf16.msra.mxu1 %v508_v0  ;;  %v515_v4 = vld [vmem:[%s616_s0 + $0x20] sm:$0xff]   ;;  %v516_v7 = vld [vmem:[%s616_s0 + $0x28] sm:$0xff]   ;;  %v517_v9 = vld [vmem:[%s616_s0 + $0x30] sm:$0xff]  }
   0x4   :  { %480 = vmatprep.subr.bf16.mxu0 %v509_v1  ;;  %484 = vmatprep.mubr.msk.bf16.mxu0 %vm91_vm0, %v511_v3  ;;  %v514_v10 = vld [vmem:[%s616_s0 + $0x18] sm:$0xff]  }
   0x5   :  { %501 = vmatprep.subr.bf16.mxu1 %v509_v1  ;;  %492 = vmatprep.mubr.msk.bf16.mxu1 %vm91_vm0, %v515_v4  ;;  %v518_v11 = vld [vmem:[%s616_s0 + $0x38] sm:$0xff]  }
   0x7   :  { %481 = vmatpush3.bf16.msra.mxu0 %v509_v1  ;;  %504 = vmatpush3.bf16.msra.mxu1 %v509_v1 }
   0x8   :  { %506 = vmatprep.subr.msk.bf16.mxu0 %vm116_vm1, %v510_v2  ;;  %507 = vmatprep.subr.msk.bf16.mxu1 %vm116_vm1, %v510_v2 }
   0xb   :  { %483 = vmatpush3.bf16.msra.mxu0 %v118_v5  ;;  %505 = vmatpush3.bf16.msra.mxu1 %v118_v5 }
   0xe   :  { %485 = vmatmul.mubr.msk.bf16.vlgmr.msra.gmra.mrb[0].mxu0 %vm91_vm0, %v512_v6  ;;  %493 = vmatmul.mubr.msk.bf16.vlgmr.msra.gmra.mrb[0].mxu1 %vm91_vm0, %v516_v7 }
   0xf   :  { %488 = vmatprep.mubr.msk.bf16.mxu0 %vm91_vm0, %v513_v8  ;;  %496 = vmatprep.mubr.msk.bf16.mxu1 %vm91_vm0, %v517_v9 }
  0x16   :  { %489 = vmatmul.mubr.msk.bf16.gmra.mrb[4].mxu0 %vm91_vm0, %v514_v10  ;;  %497 = vmatmul.mubr.msk.bf16.gmra.mrb[4].mxu1 %vm91_vm0, %v518_v11 }
  0xe1   :  { %v486_v12 = vpop.f32.mrb[0].mxu0  ;;  %v494_v13 = vpop.f32.mrb[0].mxu1 }
  0xe2   :  { %v154_v14 = vpop.f32.mrb[1].mxu0  ;;  %v186_v15 = vpop.f32.mrb[1].mxu1  ;;  %v321_v27 = vmul.f32 %v486_v12, %v486_v12  ;;  %v329_v63 = vmul.f32 %v494_v13, %v494_v13 }
  0xe3   :  { %v487_v16 = vpop.f32.mrb[2].mxu0  ;;  %v495_v17 = vpop.f32.mrb[2].mxu1  ;;  %v319_v18 = vmul.f32 %v154_v14, %v154_v14  ;;  %v327_v57 = vmul.f32 %v186_v15, %v186_v15 }
  0xe4   :  { %v428_v19 = vpack.c.bf16 %v487_v16, %v486_v12  ;;  %v157_v20 = vpop.f32.mrb[3].mxu0  ;;  %v448_v21 = vpack.c.bf16 %v495_v17, %v494_v13  ;;  %v189_v22 = vpop.f32.mrb[3].mxu1  ;;  %v322_v30 = vmul.f32 %v487_v16, %v487_v16  ;;  %v330_v2 = vmul.f32 %v495_v17, %v495_v17 }
  0xe5   :  { %v423_v23 = vpack.c.bf16 %v157_v20, %v154_v14  ;;  %v297_v24 = vadd.f32 %v157_v20, %v154_v14  ;;  %v320_v25 = vmul.f32 %v157_v20, %v157_v20  ;;  %v443_v26 = vpack.c.bf16 %v189_v22, %v186_v15 }
  0xe6   :  { %460 = vst [vmem:[%s617_s2 + $0x8] sm:$0xff] %v428_v19   ;;  %464 = vst [vmem:[%s617_s2 + $0x28] sm:$0xff] %v448_v21   ;;  %v328_v62 = vmul.f32 %v189_v22, %v189_v22 }
  0xe7   :  { %424 = vst [vmem:[%s617_s2] sm:$0xff] %v423_v23   ;;  %v298_v28 = vadd.f32 %v486_v12, %v297_v24  ;;  %v335_v29 = vadd.f32 %v320_v25, %v319_v18  ;;  %463 = vst [vmem:[%s617_s2 + $0x20] sm:$0xff] %v443_v26  }
  0xe9   :  { %v336_v31 = vadd.f32 %v335_v29, %v321_v27  ;;  %v490_v32 = vpop.f32.mrb[4].mxu0  ;;  %v299_v33 = vadd.f32 %v487_v16, %v298_v28  ;;  %v498_v34 = vpop.f32.mrb[4].mxu1 }
  0xea   :  { %v170_v35 = vpop.f32.mrb[5].mxu0  ;;  %v202_v36 = vpop.f32.mrb[5].mxu1  ;;  %v325_v51 = vmul.f32 %v490_v32, %v490_v32  ;;  %v333_v11 = vmul.f32 %v498_v34, %v498_v34 }
  0xeb   :  { %v300_v37 = vadd.f32 %v299_v33, %v170_v35  ;;  %v323_v38 = vmul.f32 %v170_v35, %v170_v35  ;;  %v337_v39 = vadd.f32 %v336_v31, %v322_v30  ;;  %v491_v40 = vpop.f32.mrb[6].mxu0  ;;  %v499_v41 = vpop.f32.mrb[6].mxu1  ;;  %v331_v5 = vmul.f32 %v202_v36, %v202_v36 }
  0xec   :  { %v438_v42 = vpack.c.bf16 %v491_v40, %v490_v32  ;;  %v173_v43 = vpop.f32.mrb[7].mxu0  ;;  %v458_v44 = vpack.c.bf16 %v499_v41, %v498_v34  ;;  %v205_v45 = vpop.f32.mrb[7].mxu1  ;;  %v326_v54 = vmul.f32 %v491_v40, %v491_v40 }
  0xed   :  { %v338_v46 = vadd.f32 %v337_v39, %v323_v38  ;;  %v433_v47 = vpack.c.bf16 %v173_v43, %v170_v35  ;;  %v301_v48 = vadd.f32 %v300_v37, %v173_v43  ;;  %v324_v49 = vmul.f32 %v173_v43, %v173_v43 }
  0xee   :  { %462 = vst [vmem:[%s617_s2 + $0x18] sm:$0xff] %v438_v42   ;;  %466 = vst [vmem:[%s617_s2 + $0x38] sm:$0xff] %v458_v44   ;;  %v453_v50 = vpack.c.bf16 %v205_v45, %v202_v36  ;;  %v332_v10 = vmul.f32 %v205_v45, %v205_v45 }
  0xef   :  { %461 = vst [vmem:[%s617_s2 + $0x10] sm:$0xff] %v433_v47   ;;  %v302_v52 = vadd.f32 %v490_v32, %v301_v48  ;;  %v339_v53 = vadd.f32 %v338_v46, %v324_v49 }
  0xf0   :  { %465 = vst [vmem:[%s617_s2 + $0x30] sm:$0xff] %v453_v50  }
  0xf1   :  { %v340_v55 = vadd.f32 %v339_v53, %v325_v51  ;;  %v303_v56 = vadd.f32 %v491_v40, %v302_v52 }
  0xf3   :  { %v304_v58 = vadd.f32 %v303_v56, %v186_v15  ;;  %v341_v59 = vadd.f32 %v340_v55, %v326_v54  ;;  %v334_v15 = vmul.f32 %v499_v41, %v499_v41 }
  0xf5   :  { %v342_v60 = vadd.f32 %v341_v59, %v327_v57  ;;  %v305_v61 = vadd.f32 %v304_v58, %v189_v22 }
  0xf7   :  { %v306_v0 = vadd.f32 %v494_v13, %v305_v61  ;;  %v343_v1 = vadd.f32 %v342_v60, %v328_v62 }
  0xf9   :  { %v344_v3 = vadd.f32 %v343_v1, %v329_v63  ;;  %v307_v4 = vadd.f32 %v495_v17, %v306_v0 }
  0xfb   :  { %v308_v6 = vadd.f32 %v307_v4, %v202_v36  ;;  %v345_v7 = vadd.f32 %v344_v3, %v330_v2 }
  0xfd   :  { %v346_v8 = vadd.f32 %v345_v7, %v331_v5  ;;  %v309_v9 = vadd.f32 %v308_v6, %v205_v45 }
  0xff   :  { %v310_v12 = vadd.f32 %v498_v34, %v309_v9  ;;  %v347_v14 = vadd.f32 %v346_v8, %v332_v10 }
 0x101   :  { %v311_v16 = vadd.f32 %v499_v41, %v310_v12  ;;  %v348_v18 = vadd.f32 %v347_v14, %v333_v11 }
 0x103   :  { %v312_v19 = vrot.slane %v311_v16, 4  ;;  %v349_v20 = vadd.f32 %v348_v18, %v334_v15 }
 0x105   :  { %v313_v21 = vadd.f32 %v312_v19, %v311_v16  ;;  %v350_v13 = vrot.slane %v349_v20, 4 }
 0x107   :  { %v314_v22 = vrot.slane %v313_v21, 2  ;;  %v351_v23 = vadd.f32 %v350_v13, %v349_v20 }
 0x109   :  { %v315_v24 = vadd.f32 %v314_v22, %v313_v21  ;;  %v352_v17 = vrot.slane %v351_v23, 2 }
 0x10b   :  { %v316_v25 = vrot.slane %v315_v24, 1  ;;  %v353_v26 = vadd.f32 %v352_v17, %v351_v23 }
 0x10d   :  { %v317_v27 = vadd.f32 %v316_v25, %v315_v24  ;;  %v354_v28 = vrot.slane %v353_v26, 1 }
 0x10f   :  { %318 = vst [vmem:[%s618_s3] sm:$0x1] %v317_v27  ;;  %v355_v29 = vadd.f32 %v354_v28, %v353_v26 }
 0x111   :  { %356 = vst [vmem:[%s619_s4] sm:$0x1] %v355_v29 }

// kernel: basic_block_forward.7
= control target key start
LH: loop header
LB: loop body
LE: loop exit
PB: predicated region body
PF: predicated region fallthrough
CT: control target
= control target key end

     0   :  { %s647_s0 = inlined_call_operand.vmem [shape: bf16[128,128], index: 0, kind: input, shape index: {}]   ;;  %s648_s1 = inlined_call_operand.vmem [shape: f32[1,128], index: 1, kind: input, shape index: {}]   ;;  %s649_s2 = inlined_call_operand.vmem [shape: f32[1,128], index: 2, kind: input, shape index: {}]   ;;  %s650_s3 = inlined_call_operand.vmem [shape: bf16[128,128], index: 3, kind: input, shape index: {}]   ;;  %s651_s4 = inlined_call_operand.vmem [shape: f32[1,128], index: 4, kind: input, shape index: {}]   ;;  %s652_s5 = inlined_call_operand.vmem [shape: f32[1,128], index: 5, kind: input, shape index: {}]   ;;  %s653_s6 = inlined_call_operand.vmem [shape: bf16[128,128], index: 6, kind: output, shape index: {}]  }
   0x1   :  { %v332_v0 = vld [vmem:[%s647_s0] sm:$0xff]   ;;  %v435_v9 = vld [vmem:[%s647_s0 + $0x8] sm:$0xff]   ;;  %v436_v20 = vld [vmem:[%s647_s0 + $0x10] sm:$0xff]  }
   0x2   :  { %v497_v1 = vld [vmem:[%s648_s1] ss:$0 sm:$0xff]  ;;  %v333_v2 = vunpack.c.l.bf16 %v332_v0  ;;  %v334_v3 = vunpack.c.h.bf16 %v332_v0  ;;  %v442_v10 = vld [vmem:[%s650_s3 + $0x8] sm:$0xff]   ;;  %v337_v14 = vunpack.c.l.bf16 %v435_v9  ;;  %v338_v15 = vunpack.c.h.bf16 %v435_v9  ;;  %v443_v29 = vld [vmem:[%s650_s3 + $0x10] sm:$0xff]  }
   0x3   :  { %v364_v4 = vld [vmem:[%s650_s3] sm:$0xff]   ;;  %v369_v18 = vunpack.c.l.bf16 %v442_v10  ;;  %v370_v19 = vunpack.c.h.bf16 %v442_v10  ;;  %v341_v32 = vunpack.c.l.bf16 %v436_v20  ;;  %v342_v33 = vunpack.c.h.bf16 %v436_v20  ;;  %v437_v42 = vld [vmem:[%s647_s0 + $0x18] sm:$0xff]  }
   0x4   :  { %v505_v5 = vld [vmem:[%s651_s4] ss:$0 sm:$0xff]  ;;  %v365_v7 = vunpack.c.l.bf16 %v364_v4  ;;  %v366_v8 = vunpack.c.h.bf16 %v364_v4  ;;  %v62_v11 = vmul.f32 %v333_v2, %v497_v1  ;;  %v63_v12 = vmul.f32 %v334_v3, %v497_v1  ;;  %v444_v47 = vld [vmem:[%s650_s3 + $0x18] sm:$0xff]  }
   0x5   :  { %v510_v6 = vld [vmem:[%s649_s2] ss:$0 sm:$0xff]  ;;  %v64_v23 = vmul.f32 %v337_v14, %v497_v1  ;;  %v65_v24 = vmul.f32 %v338_v15, %v497_v1  ;;  %v142_v27 = vmul.f32 %v369_v18, %v505_v5  ;;  %v143_v28 = vmul.f32 %v370_v19, %v505_v5  ;;  %v439_v14 = vld [vmem:[%s647_s0 + $0x28] sm:$0xff]  }
   0x6   :  { %v523_v13 = vld [vmem:[%s652_s5] ss:$0 sm:$0xff]  ;;  %v140_v16 = vmul.f32 %v365_v7, %v505_v5  ;;  %v141_v17 = vmul.f32 %v366_v8, %v505_v5  ;;  %v85_v21 = vadd.f32 %v510_v6, %v62_v11  ;;  %v86_v22 = vadd.f32 %v510_v6, %v63_v12 }
   0x7   :  { %v87_v30 = vadd.f32 %v510_v6, %v64_v23  ;;  %v88_v31 = vadd.f32 %v510_v6, %v65_v24  ;;  %v165_v36 = vadd.f32 %v523_v13, %v142_v27  ;;  %v166_v37 = vadd.f32 %v523_v13, %v143_v28  ;;  %v438_v52 = vld [vmem:[%s647_s0 + $0x20] sm:$0xff]   ;;  %v446_v23 = vld [vmem:[%s650_s3 + $0x28] sm:$0xff]  }
   0x8   :  { %v163_v25 = vadd.f32 %v523_v13, %v140_v16  ;;  %v164_v26 = vadd.f32 %v523_v13, %v141_v17  ;;  %v66_v38 = vmul.f32 %v341_v32, %v497_v1  ;;  %v67_v39 = vmul.f32 %v342_v33, %v497_v1  ;;  %v445_v8 = vld [vmem:[%s650_s3 + $0x20] sm:$0xff]   ;;  %v440_v32 = vld [vmem:[%s647_s0 + $0x30] sm:$0xff]  }
   0x9   :  { %v373_v40 = vunpack.c.l.bf16 %v443_v29  ;;  %v374_v41 = vunpack.c.h.bf16 %v443_v29  ;;  %v181_v45 = vadd.f32 %v165_v36, %v87_v30  ;;  %v182_v46 = vadd.f32 %v166_v37, %v88_v31 }
   0xa   :  { %v179_v34 = vadd.f32 %v163_v25, %v85_v21  ;;  %v180_v35 = vadd.f32 %v164_v26, %v86_v22  ;;  %v89_v48 = vadd.f32 %v510_v6, %v66_v38  ;;  %v90_v49 = vadd.f32 %v510_v6, %v67_v39 }
   0xb   :  { %v144_v50 = vmul.f32 %v373_v40, %v505_v5  ;;  %v145_v51 = vmul.f32 %v374_v41, %v505_v5  ;;  %v197_v54 = vmax.f32 %v181_v45, 0.0  ;;  %v198_v55 = vmax.f32 %v182_v46, 0.0  ;;  %v447_v45 = vld [vmem:[%s650_s3 + $0x30] sm:$0xff]  }
   0xc   :  { %v195_v43 = vmax.f32 %v179_v34, 0.0  ;;  %v196_v44 = vmax.f32 %v180_v35, 0.0  ;;  %v345_v56 = vunpack.c.l.bf16 %v437_v42  ;;  %v346_v59 = vunpack.c.h.bf16 %v437_v42 }
   0xd   :  { %v167_v57 = vadd.f32 %v523_v13, %v144_v50  ;;  %v168_v58 = vadd.f32 %v523_v13, %v145_v51  ;;  %v377_v60 = vunpack.c.l.bf16 %v444_v47  ;;  %v403_v61 = vpack.c.bf16 %v198_v55, %v197_v54  ;;  %v441_v54 = vld [vmem:[%s647_s0 + $0x38] sm:$0xff]  }
   0xe   :  { %v398_v53 = vpack.c.bf16 %v196_v44, %v195_v43  ;;  %v68_v62 = vmul.f32 %v345_v56, %v497_v1  ;;  %v378_v63 = vunpack.c.h.bf16 %v444_v47  ;;  %v349_v0 = vunpack.c.l.bf16 %v438_v52 }
   0xf   :  { %v183_v2 = vadd.f32 %v167_v57, %v89_v48  ;;  %v184_v3 = vadd.f32 %v168_v58, %v90_v49  ;;  %v69_v4 = vmul.f32 %v346_v59, %v497_v1  ;;  %v146_v7 = vmul.f32 %v377_v60, %v505_v5  ;;  %449 = vst [vmem:[%s653_s6 + $0x8] sm:$0xff] %v403_v61  }
  0x10   :  { %399 = vst [vmem:[%s653_s6] sm:$0xff] %v398_v53   ;;  %v91_v9 = vadd.f32 %v510_v6, %v68_v62  ;;  %v147_v10 = vmul.f32 %v378_v63, %v505_v5  ;;  %v350_v11 = vunpack.c.h.bf16 %v438_v52  ;;  %v70_v12 = vmul.f32 %v349_v0, %v497_v1 }
  0x11   :  { %v199_v15 = vmax.f32 %v183_v2, 0.0  ;;  %v200_v16 = vmax.f32 %v184_v3, 0.0  ;;  %v92_v17 = vadd.f32 %v510_v6, %v69_v4  ;;  %v169_v18 = vadd.f32 %v523_v13, %v146_v7  ;;  %v448_v4 = vld [vmem:[%s650_s3 + $0x38] sm:$0xff]  }
  0x12   :  { %v170_v19 = vadd.f32 %v523_v13, %v147_v10  ;;  %v71_v20 = vmul.f32 %v350_v11, %v497_v1  ;;  %v93_v21 = vadd.f32 %v510_v6, %v70_v12  ;;  %v381_v22 = vunpack.c.l.bf16 %v445_v8 }
  0x13   :  { %v408_v24 = vpack.c.bf16 %v200_v16, %v199_v15  ;;  %v185_v25 = vadd.f32 %v169_v18, %v91_v9  ;;  %v382_v26 = vunpack.c.h.bf16 %v445_v8  ;;  %v353_v27 = vunpack.c.l.bf16 %v439_v14 }
  0x14   :  { %v186_v28 = vadd.f32 %v170_v19, %v92_v17  ;;  %v94_v29 = vadd.f32 %v510_v6, %v71_v20  ;;  %v148_v30 = vmul.f32 %v381_v22, %v505_v5  ;;  %v354_v31 = vunpack.c.h.bf16 %v439_v14 }
  0x15   :  { %450 = vst [vmem:[%s653_s6 + $0x10] sm:$0xff] %v408_v24   ;;  %v201_v33 = vmax.f32 %v185_v25, 0.0  ;;  %v149_v34 = vmul.f32 %v382_v26, %v505_v5  ;;  %v72_v35 = vmul.f32 %v353_v27, %v497_v1  ;;  %v385_v36 = vunpack.c.l.bf16 %v446_v23 }
  0x16   :  { %v202_v37 = vmax.f32 %v186_v28, 0.0  ;;  %v171_v38 = vadd.f32 %v523_v13, %v148_v30  ;;  %v73_v39 = vmul.f32 %v354_v31, %v497_v1  ;;  %v386_v40 = vunpack.c.h.bf16 %v446_v23 }
  0x17   :  { %v172_v41 = vadd.f32 %v523_v13, %v149_v34  ;;  %v95_v42 = vadd.f32 %v510_v6, %v72_v35  ;;  %v150_v43 = vmul.f32 %v385_v36, %v505_v5  ;;  %v357_v44 = vunpack.c.l.bf16 %v440_v32 }
  0x18   :  { %v413_v46 = vpack.c.bf16 %v202_v37, %v201_v33  ;;  %v187_v47 = vadd.f32 %v171_v38, %v93_v21  ;;  %v96_v48 = vadd.f32 %v510_v6, %v73_v39  ;;  %v151_v49 = vmul.f32 %v386_v40, %v505_v5 }
  0x19   :  { %v188_v50 = vadd.f32 %v172_v41, %v94_v29  ;;  %v173_v51 = vadd.f32 %v523_v13, %v150_v43  ;;  %v358_v52 = vunpack.c.h.bf16 %v440_v32  ;;  %v74_v53 = vmul.f32 %v357_v44, %v497_v1 }
  0x1a   :  { %451 = vst [vmem:[%s653_s6 + $0x18] sm:$0xff] %v413_v46   ;;  %v203_v55 = vmax.f32 %v187_v47, 0.0  ;;  %v174_v56 = vadd.f32 %v523_v13, %v151_v49  ;;  %v389_v57 = vunpack.c.l.bf16 %v447_v45  ;;  %v390_v58 = vunpack.c.h.bf16 %v447_v45 }
  0x1b   :  { %v204_v59 = vmax.f32 %v188_v50, 0.0  ;;  %v189_v60 = vadd.f32 %v173_v51, %v95_v42  ;;  %v75_v61 = vmul.f32 %v358_v52, %v497_v1  ;;  %v97_v62 = vadd.f32 %v510_v6, %v74_v53 }
  0x1c   :  { %v190_v63 = vadd.f32 %v174_v56, %v96_v48  ;;  %v152_v0 = vmul.f32 %v389_v57, %v505_v5  ;;  %v153_v2 = vmul.f32 %v390_v58, %v505_v5  ;;  %v361_v3 = vunpack.c.l.bf16 %v441_v54 }
  0x1d   :  { %v418_v7 = vpack.c.bf16 %v204_v59, %v203_v55  ;;  %v205_v8 = vmax.f32 %v189_v60, 0.0  ;;  %v98_v9 = vadd.f32 %v510_v6, %v75_v61  ;;  %v362_v10 = vunpack.c.h.bf16 %v441_v54 }
  0x1e   :  { %v206_v11 = vmax.f32 %v190_v63, 0.0  ;;  %v175_v12 = vadd.f32 %v523_v13, %v152_v0  ;;  %v176_v14 = vadd.f32 %v523_v13, %v153_v2  ;;  %v76_v15 = vmul.f32 %v361_v3, %v497_v1 }
  0x1f   :  { %452 = vst [vmem:[%s653_s6 + $0x20] sm:$0xff] %v418_v7   ;;  %v77_v16 = vmul.f32 %v362_v10, %v497_v1  ;;  %v393_v17 = vunpack.c.l.bf16 %v448_v4  ;;  %v394_v18 = vunpack.c.h.bf16 %v448_v4 }
  0x20   :  { %v423_v19 = vpack.c.bf16 %v206_v11, %v205_v8  ;;  %v191_v20 = vadd.f32 %v175_v12, %v97_v62  ;;  %v192_v21 = vadd.f32 %v176_v14, %v98_v9  ;;  %v99_v22 = vadd.f32 %v510_v6, %v76_v15 }
  0x21   :  { %v100_v23 = vadd.f32 %v510_v6, %v77_v16  ;;  %v154_v24 = vmul.f32 %v393_v17, %v505_v5  ;;  %v155_v25 = vmul.f32 %v394_v18, %v505_v5 }
  0x22   :  { %453 = vst [vmem:[%s653_s6 + $0x28] sm:$0xff] %v423_v19   ;;  %v207_v26 = vmax.f32 %v191_v20, 0.0  ;;  %v208_v27 = vmax.f32 %v192_v21, 0.0 }
  0x23   :  { %v177_v1 = vadd.f32 %v523_v13, %v154_v24  ;;  %v178_v28 = vadd.f32 %v523_v13, %v155_v25 }
  0x24   :  { %v428_v29 = vpack.c.bf16 %v208_v27, %v207_v26 }
  0x25   :  { %v193_v30 = vadd.f32 %v177_v1, %v99_v22  ;;  %v194_v31 = vadd.f32 %v178_v28, %v100_v23 }
  0x26   :  { %454 = vst [vmem:[%s653_s6 + $0x30] sm:$0xff] %v428_v29  }
  0x27   :  { %v209_v6 = vmax.f32 %v193_v30, 0.0  ;;  %v210_v32 = vmax.f32 %v194_v31, 0.0 }
  0x29   :  { %v433_v5 = vpack.c.bf16 %v210_v32, %v209_v6 }
  0x2b   :  { %455 = vst [vmem:[%s653_s6 + $0x38] sm:$0xff] %v433_v5  }

// kernel: basic_block_forward.6
= control target key start
LH: loop header
LB: loop body
LE: loop exit
PB: predicated region body
PF: predicated region fallthrough
CT: control target
= control target key end

     0   :  { %vm324_vm0 = vcmask 1041408   ;;  %vm299_vm1 = vcmask 31744   ;;  %vm116_vm2 = vcmask 588800   ;;  %vm141_vm3 = vcmask 1043456   ;;  %s1205_s1 = inlined_call_operand.vmem [shape: bf16[72,128], index: 1, kind: input, shape index: {}]   ;;  %s1206_s3 = inlined_call_operand.vmem [shape: bf16[4,128], index: 3, kind: input, shape index: {}]   ;;  %s1207_s2 = inlined_call_operand.vmem [shape: bf16[128,4], index: 2, kind: input, shape index: {}]   ;;  %s1208_s0 = inlined_call_operand.vmem [shape: bf16[128,72], index: 0, kind: input, shape index: {}]   ;;  %s1209_s5 = inlined_call_operand.vmem [shape: bf16[128,128], index: 5, kind: output, shape index: {1}]   ;;  %s1210_s4 = inlined_call_operand.vmem [shape: bf16[128,128], index: 4, kind: output, shape index: {0}]   ;;  %s1211_s8 = inlined_call_operand.vmem [shape: f32[1,1,128], index: 8, kind: output, shape index: {4}]   ;;  %s1212_s9 = inlined_call_operand.vmem [shape: f32[1,1,128], index: 9, kind: output, shape index: {5}]   ;;  %s1213_s6 = inlined_call_operand.vmem [shape: f32[1,1,128], index: 6, kind: output, shape index: {2}]   ;;  %s1214_s7 = inlined_call_operand.vmem [shape: f32[1,1,128], index: 7, kind: output, shape index: {3}]  }
   0x1   :  { %v992_v0 = vld [vmem:[%s1205_s1] sm:$0xff]   ;;  %v993_v2 = vld [vmem:[%s1205_s1 + $0x8] sm:$0xff]   ;;  %v996_v6 = vld [vmem:[%s1205_s1 + $0x10] sm:$0xff]  }
   0x2   :  { %v258_v1 = vld [vmem:[%s1206_s3] sm:$0x3]  ;;  %946 = vmatprep.subr.bf16.mxu0 %v992_v0  ;;  %v995_v5 = vld [vmem:[%s1207_s2 + $0x8] sm:$0xff]   ;;  %v998_v7 = vld [vmem:[%s1207_s2 + $0x10] sm:$0xff]  }
   0x3   :  { %991 = vmatprep.subr.msk.bf16.mxu1 %vm324_vm0, %v258_v1  ;;  %v326_v3 = vsel %vm324_vm0, %v258_v1, 0  ;;  %947 = vmatpush3.bf16.msra.mxu0 %v992_v0  ;;  %v994_v4 = vld [vmem:[%s1207_s2] sm:$0xff]   ;;  %v997_v8 = vld [vmem:[%s1205_s1 + $0x18] sm:$0xff]   ;;  %v1002_v14 = vld [vmem:[%s1208_s0 + $0x8] sm:$0xff]  }
   0x4   :  { %973 = vmatpush3.bf16.msra.mxu1 %v326_v3  ;;  %948 = vmatprep.subr.bf16.mxu0 %v993_v2  ;;  %v1001_v9 = vld [vmem:[%s1208_s0] sm:$0xff]   ;;  %v999_v10 = vld [vmem:[%s1207_s2 + $0x18] sm:$0xff]   ;;  %v1004_v15 = vld [vmem:[%s1207_s2 + $0x28] sm:$0xff]  }
   0x5   :  { %974 = vmatprep.mubr.msk.bf16.mxu1 %vm299_vm1, %v994_v4  ;;  %956 = vmatprep.mubr.msk.bf16.mxu0 %vm116_vm2, %v1001_v9  ;;  %v1003_v11 = vld [vmem:[%s1207_s2 + $0x20] sm:$0xff]   ;;  %v1005_v16 = vld [vmem:[%s1208_s0 + $0x10] sm:$0xff]   ;;  %v1006_v18 = vld [vmem:[%s1208_s0 + $0x18] sm:$0xff]  }
   0x6   :  { %v1000_v12 = vld [vmem:[%s1205_s1 + $0x20] ss:$0 sps:$4 sm:$0xff]   ;;  %v1007_v17 = vld [vmem:[%s1207_s2 + $0x30] sm:$0xff]   ;;  %v1008_v19 = vld [vmem:[%s1207_s2 + $0x38] sm:$0xff]  }
   0x7   :  { %975 = vmatmul.mubr.msk.bf16.vlgmr.msra.gmra.mrb[0].mxu1 %vm299_vm1, %v995_v5  ;;  %949 = vmatpush3.bf16.msra.mxu0 %v993_v2  ;;  %v143_v13 = vsel %vm141_vm3, %v1000_v12, 0  ;;  %v1009_v20 = vld [vmem:[%s1208_s0 + $0x20] sm:$0xff]   ;;  %v1010_v21 = vld [vmem:[%s1208_s0 + $0x28] sm:$0xff]   ;;  %v1011_v22 = vld [vmem:[%s1208_s0 + $0x30] sm:$0xff]  }
   0x8   :  { %950 = vmatprep.subr.bf16.mxu0 %v996_v6  ;;  %978 = vmatprep.mubr.msk.bf16.mxu1 %vm299_vm1, %v998_v7  ;;  %v1012_v23 = vld [vmem:[%s1208_s0 + $0x38] sm:$0xff]  }
   0xb   :  { %951 = vmatpush3.bf16.msra.mxu0 %v996_v6 }
   0xc   :  { %952 = vmatprep.subr.bf16.mxu0 %v997_v8 }
   0xf   :  { %979 = vmatmul.mubr.msk.bf16.gmra.mrb[4].mxu1 %vm299_vm1, %v999_v10  ;;  %953 = vmatpush3.bf16.msra.mxu0 %v997_v8 }
  0x10   :  { %982 = vmatprep.mubr.msk.bf16.mxu1 %vm299_vm1, %v1003_v11  ;;  %990 = vmatprep.subr.msk.bf16.mxu0 %vm141_vm3, %v1000_v12 }
  0x13   :  { %955 = vmatpush3.bf16.msra.mxu0 %v143_v13 }
  0x16   :  { %957 = vmatmul.mubr.msk.bf16.vlgmr.msra.gmra.mrb[0].mxu0 %vm116_vm2, %v1002_v14 }
  0x17   :  { %983 = vmatmul.mubr.msk.bf16.gmra.mrb[8].mxu1 %vm299_vm1, %v1004_v15  ;;  %960 = vmatprep.mubr.msk.bf16.mxu0 %vm116_vm2, %v1005_v16 }
  0x18   :  { %986 = vmatprep.mubr.msk.bf16.mxu1 %vm299_vm1, %v1007_v17 }
  0x1e   :  { %961 = vmatmul.mubr.msk.bf16.gmra.mrb[4].mxu0 %vm116_vm2, %v1006_v18 }
  0x1f   :  { %987 = vmatmul.mubr.msk.bf16.gmra.mrb[12].mxu1 %vm299_vm1, %v1008_v19  ;;  %964 = vmatprep.mubr.msk.bf16.mxu0 %vm116_vm2, %v1009_v20 }
  0x26   :  { %965 = vmatmul.mubr.msk.bf16.gmra.mrb[8].mxu0 %vm116_vm2, %v1010_v21 }
  0x27   :  { %968 = vmatprep.mubr.msk.bf16.mxu0 %vm116_vm2, %v1011_v22 }
  0x2e   :  { %969 = vmatmul.mubr.msk.bf16.gmra.mrb[12].mxu0 %vm116_vm2, %v1012_v23 }
  0xda   :  { %v976_v24 = vpop.f32.mrb[0].mxu1 }
  0xdb   :  { %v362_v25 = vpop.f32.mrb[1].mxu1  ;;  %v669_v30 = vmul.f32 %v976_v24, %v976_v24 }
  0xdc   :  { %v667_v26 = vmul.f32 %v362_v25, %v362_v25  ;;  %v977_v27 = vpop.f32.mrb[2].mxu1 }
  0xdd   :  { %v878_v28 = vpack.c.bf16 %v977_v27, %v976_v24  ;;  %v365_v29 = vpop.f32.mrb[3].mxu1  ;;  %v670_v34 = vmul.f32 %v977_v27, %v977_v27 }
  0xde   :  { %v873_v31 = vpack.c.bf16 %v365_v29, %v362_v25  ;;  %v645_v32 = vadd.f32 %v365_v29, %v362_v25  ;;  %v668_v33 = vmul.f32 %v365_v29, %v365_v29 }
  0xdf   :  { %917 = vst [vmem:[%s1209_s5 + $0x8] sm:$0xff] %v878_v28  }
  0xe0   :  { %874 = vst [vmem:[%s1209_s5] sm:$0xff] %v873_v31   ;;  %v646_v35 = vadd.f32 %v976_v24, %v645_v32  ;;  %v683_v36 = vadd.f32 %v668_v33, %v667_v26 }
  0xe2   :  { %v684_v37 = vadd.f32 %v683_v36, %v669_v30  ;;  %v980_v38 = vpop.f32.mrb[4].mxu1  ;;  %v647_v39 = vadd.f32 %v977_v27, %v646_v35 }
  0xe3   :  { %v378_v40 = vpop.f32.mrb[5].mxu1  ;;  %v673_v45 = vmul.f32 %v980_v38, %v980_v38 }
  0xe4   :  { %v648_v41 = vadd.f32 %v647_v39, %v378_v40  ;;  %v671_v42 = vmul.f32 %v378_v40, %v378_v40  ;;  %v685_v43 = vadd.f32 %v684_v37, %v670_v34  ;;  %v981_v44 = vpop.f32.mrb[6].mxu1 }
  0xe5   :  { %v888_v46 = vpack.c.bf16 %v981_v44, %v980_v38  ;;  %v381_v47 = vpop.f32.mrb[7].mxu1  ;;  %v674_v52 = vmul.f32 %v981_v44, %v981_v44 }
  0xe6   :  { %v686_v48 = vadd.f32 %v685_v43, %v671_v42  ;;  %v883_v49 = vpack.c.bf16 %v381_v47, %v378_v40  ;;  %v649_v50 = vadd.f32 %v648_v41, %v381_v47  ;;  %v672_v51 = vmul.f32 %v381_v47, %v381_v47 }
  0xe7   :  { %919 = vst [vmem:[%s1209_s5 + $0x18] sm:$0xff] %v888_v46  }
  0xe8   :  { %918 = vst [vmem:[%s1209_s5 + $0x10] sm:$0xff] %v883_v49   ;;  %v650_v53 = vadd.f32 %v980_v38, %v649_v50  ;;  %v687_v54 = vadd.f32 %v686_v48, %v672_v51 }
  0xe9   :  { %v958_v56 = vpop.f32.mrb[0].mxu0 }
  0xea   :  { %v688_v55 = vadd.f32 %v687_v54, %v673_v45  ;;  %v984_v57 = vpop.f32.mrb[8].mxu1  ;;  %v651_v58 = vadd.f32 %v981_v44, %v650_v53  ;;  %v179_v59 = vpop.f32.mrb[1].mxu0  ;;  %v609_v15 = vmul.f32 %v958_v56, %v958_v56 }
  0xeb   :  { %v394_v60 = vpop.f32.mrb[9].mxu1  ;;  %v959_v61 = vpop.f32.mrb[2].mxu0  ;;  %v607_v2 = vmul.f32 %v179_v59, %v179_v59  ;;  %v677_v11 = vmul.f32 %v984_v57, %v984_v57 }
  0xec   :  { %v652_v62 = vadd.f32 %v651_v58, %v394_v60  ;;  %v675_v63 = vmul.f32 %v394_v60, %v394_v60  ;;  %v689_v0 = vadd.f32 %v688_v55, %v674_v52  ;;  %v985_v1 = vpop.f32.mrb[10].mxu1  ;;  %v838_v3 = vpack.c.bf16 %v959_v61, %v958_v56  ;;  %v182_v4 = vpop.f32.mrb[3].mxu0 }
  0xed   :  { %v898_v5 = vpack.c.bf16 %v985_v1, %v984_v57  ;;  %v397_v6 = vpop.f32.mrb[11].mxu1  ;;  %v833_v7 = vpack.c.bf16 %v182_v4, %v179_v59  ;;  %v585_v8 = vadd.f32 %v182_v4, %v179_v59  ;;  %v608_v9 = vmul.f32 %v182_v4, %v182_v4 }
  0xee   :  { %v690_v10 = vadd.f32 %v689_v0, %v675_v63  ;;  %910 = vst [vmem:[%s1210_s4 + $0x8] sm:$0xff] %v838_v3   ;;  %v893_v12 = vpack.c.bf16 %v397_v6, %v394_v60  ;;  %v653_v13 = vadd.f32 %v652_v62, %v397_v6  ;;  %v676_v14 = vmul.f32 %v397_v6, %v397_v6 }
  0xef   :  { %921 = vst [vmem:[%s1209_s5 + $0x28] sm:$0xff] %v898_v5   ;;  %834 = vst [vmem:[%s1210_s4] sm:$0xff] %v833_v7   ;;  %v586_v16 = vadd.f32 %v958_v56, %v585_v8  ;;  %v623_v17 = vadd.f32 %v608_v9, %v607_v2  ;;  %v678_v18 = vmul.f32 %v985_v1, %v985_v1 }
  0xf0   :  { %920 = vst [vmem:[%s1209_s5 + $0x20] sm:$0xff] %v893_v12   ;;  %v654_v19 = vadd.f32 %v984_v57, %v653_v13  ;;  %v691_v20 = vadd.f32 %v690_v10, %v676_v14  ;;  %v610_v21 = vmul.f32 %v959_v61, %v959_v61 }
  0xf1   :  { %v624_v22 = vadd.f32 %v623_v17, %v609_v15  ;;  %v962_v23 = vpop.f32.mrb[4].mxu0  ;;  %v587_v24 = vadd.f32 %v959_v61, %v586_v16 }
  0xf2   :  { %v988_v25 = vpop.f32.mrb[12].mxu1  ;;  %v692_v26 = vadd.f32 %v691_v20, %v677_v11  ;;  %v195_v27 = vpop.f32.mrb[5].mxu0  ;;  %v655_v29 = vadd.f32 %v985_v1, %v654_v19  ;;  %v613_v36 = vmul.f32 %v962_v23, %v962_v23 }
  0xf3   :  { %v410_v28 = vpop.f32.mrb[13].mxu1  ;;  %v588_v30 = vadd.f32 %v587_v24, %v195_v27  ;;  %v611_v31 = vmul.f32 %v195_v27, %v195_v27  ;;  %v625_v32 = vadd.f32 %v624_v22, %v610_v21  ;;  %v963_v33 = vpop.f32.mrb[6].mxu0  ;;  %v681_v46 = vmul.f32 %v988_v25, %v988_v25 }
  0xf4   :  { %v679_v34 = vmul.f32 %v410_v28, %v410_v28  ;;  %v989_v35 = vpop.f32.mrb[14].mxu1  ;;  %v848_v37 = vpack.c.bf16 %v963_v33, %v962_v23  ;;  %v198_v38 = vpop.f32.mrb[7].mxu0  ;;  %v656_v39 = vadd.f32 %v655_v29, %v410_v28  ;;  %v693_v40 = vadd.f32 %v692_v26, %v678_v18 }
  0xf5   :  { %v413_v41 = vpop.f32.mrb[15].mxu1  ;;  %v626_v42 = vadd.f32 %v625_v32, %v611_v31  ;;  %v843_v43 = vpack.c.bf16 %v198_v38, %v195_v27  ;;  %v589_v44 = vadd.f32 %v588_v30, %v198_v38  ;;  %v612_v45 = vmul.f32 %v198_v38, %v198_v38 }
  0xf6   :  { %912 = vst [vmem:[%s1210_s4 + $0x18] sm:$0xff] %v848_v37   ;;  %v694_v47 = vadd.f32 %v693_v40, %v679_v34  ;;  %v908_v48 = vpack.c.bf16 %v989_v35, %v988_v25  ;;  %v903_v49 = vpack.c.bf16 %v413_v41, %v410_v28  ;;  %v657_v52 = vadd.f32 %v656_v39, %v413_v41 }
  0xf7   :  { %911 = vst [vmem:[%s1210_s4 + $0x10] sm:$0xff] %v843_v43   ;;  %v590_v50 = vadd.f32 %v962_v23, %v589_v44  ;;  %v627_v51 = vadd.f32 %v626_v42, %v612_v45  ;;  %v680_v53 = vmul.f32 %v413_v41, %v413_v41  ;;  %v682_v54 = vmul.f32 %v989_v35, %v989_v35 }
  0xf8   :  { %923 = vst [vmem:[%s1209_s5 + $0x38] sm:$0xff] %v908_v48   ;;  %922 = vst [vmem:[%s1209_s5 + $0x30] sm:$0xff] %v903_v49   ;;  %v658_v56 = vadd.f32 %v988_v25, %v657_v52  ;;  %v614_v60 = vmul.f32 %v963_v33, %v963_v33 }
  0xf9   :  { %v628_v55 = vadd.f32 %v627_v51, %v613_v36  ;;  %v695_v57 = vadd.f32 %v694_v47, %v680_v53  ;;  %v966_v58 = vpop.f32.mrb[8].mxu0  ;;  %v591_v59 = vadd.f32 %v963_v33, %v590_v50 }
  0xfa   :  { %v211_v61 = vpop.f32.mrb[9].mxu0  ;;  %v659_v62 = vadd.f32 %v989_v35, %v658_v56  ;;  %v617_v15 = vmul.f32 %v966_v58, %v966_v58 }
  0xfb   :  { %v696_v63 = vadd.f32 %v695_v57, %v681_v46  ;;  %v592_v0 = vadd.f32 %v591_v59, %v211_v61  ;;  %v615_v1 = vmul.f32 %v211_v61, %v211_v61  ;;  %v967_v2 = vpop.f32.mrb[10].mxu0  ;;  %v629_v3 = vadd.f32 %v628_v55, %v614_v60 }
  0xfc   :  { %v858_v4 = vpack.c.bf16 %v967_v2, %v966_v58  ;;  %v214_v5 = vpop.f32.mrb[11].mxu0  ;;  %v660_v6 = vrot.slane %v659_v62, 4  ;;  %v618_v21 = vmul.f32 %v967_v2, %v967_v2 }
  0xfd   :  { %v697_v7 = vadd.f32 %v696_v63, %v682_v54  ;;  %v853_v8 = vpack.c.bf16 %v214_v5, %v211_v61  ;;  %v593_v9 = vadd.f32 %v592_v0, %v214_v5  ;;  %v630_v10 = vadd.f32 %v629_v3, %v615_v1 }
  0xfe   :  { %914 = vst [vmem:[%s1210_s4 + $0x28] sm:$0xff] %v858_v4   ;;  %v616_v11 = vmul.f32 %v214_v5, %v214_v5  ;;  %v661_v12 = vadd.f32 %v660_v6, %v659_v62 }
  0xff   :  { %v698_v13 = vrot.slane %v697_v7, 4  ;;  %913 = vst [vmem:[%s1210_s4 + $0x20] sm:$0xff] %v853_v8   ;;  %v594_v14 = vadd.f32 %v966_v58, %v593_v9 }
 0x100   :  { %v631_v16 = vadd.f32 %v630_v10, %v616_v11  ;;  %v662_v17 = vrot.slane %v661_v12, 2 }
 0x101   :  { %v699_v18 = vadd.f32 %v698_v13, %v697_v7  ;;  %v970_v19 = vpop.f32.mrb[12].mxu0  ;;  %v595_v20 = vadd.f32 %v967_v2, %v594_v14 }
 0x102   :  { %v632_v22 = vadd.f32 %v631_v16, %v617_v15  ;;  %v227_v23 = vpop.f32.mrb[13].mxu0  ;;  %v663_v24 = vadd.f32 %v662_v17, %v661_v12  ;;  %v621_v41 = vmul.f32 %v970_v19, %v970_v19 }
 0x103   :  { %v700_v25 = vrot.slane %v699_v18, 2  ;;  %v596_v26 = vadd.f32 %v595_v20, %v227_v23  ;;  %v619_v27 = vmul.f32 %v227_v23, %v227_v23  ;;  %v971_v28 = vpop.f32.mrb[14].mxu0 }
 0x104   :  { %v633_v29 = vadd.f32 %v632_v22, %v618_v21  ;;  %v868_v30 = vpack.c.bf16 %v971_v28, %v970_v19  ;;  %v230_v31 = vpop.f32.mrb[15].mxu0  ;;  %v664_v32 = vrot.slane %v663_v24, 1  ;;  %v622_v45 = vmul.f32 %v971_v28, %v971_v28 }
 0x105   :  { %v701_v33 = vadd.f32 %v700_v25, %v699_v18  ;;  %v863_v34 = vpack.c.bf16 %v230_v31, %v227_v23  ;;  %v597_v35 = vadd.f32 %v596_v26, %v230_v31  ;;  %v620_v37 = vmul.f32 %v230_v31, %v230_v31 }
 0x106   :  { %v634_v36 = vadd.f32 %v633_v29, %v619_v27  ;;  %916 = vst [vmem:[%s1210_s4 + $0x38] sm:$0xff] %v868_v30   ;;  %v665_v38 = vadd.f32 %v664_v32, %v663_v24 }
 0x107   :  { %v702_v39 = vrot.slane %v701_v33, 1  ;;  %915 = vst [vmem:[%s1210_s4 + $0x30] sm:$0xff] %v863_v34   ;;  %v598_v40 = vadd.f32 %v970_v19, %v597_v35 }
 0x108   :  { %v635_v42 = vadd.f32 %v634_v36, %v620_v37  ;;  %666 = vst [vmem:[%s1211_s8] sm:$0x1] %v665_v38 }
 0x109   :  { %v703_v43 = vadd.f32 %v702_v39, %v701_v33  ;;  %v599_v44 = vadd.f32 %v971_v28, %v598_v40 }
 0x10a   :  { %v636_v46 = vadd.f32 %v635_v42, %v621_v41 }
 0x10b   :  { %704 = vst [vmem:[%s1212_s9] sm:$0x1] %v703_v43  ;;  %v600_v47 = vrot.slane %v599_v44, 4 }
 0x10c   :  { %v637_v48 = vadd.f32 %v636_v46, %v622_v45 }
 0x10d   :  { %v601_v49 = vadd.f32 %v600_v47, %v599_v44 }
 0x10e   :  { %v638_v50 = vrot.slane %v637_v48, 4 }
 0x10f   :  { %v602_v51 = vrot.slane %v601_v49, 2 }
 0x110   :  { %v639_v52 = vadd.f32 %v638_v50, %v637_v48 }
 0x111   :  { %v603_v53 = vadd.f32 %v602_v51, %v601_v49 }
 0x112   :  { %v640_v54 = vrot.slane %v639_v52, 2 }
 0x113   :  { %v604_v55 = vrot.slane %v603_v53, 1 }
 0x114   :  { %v641_v56 = vadd.f32 %v640_v54, %v639_v52 }
 0x115   :  { %v605_v57 = vadd.f32 %v604_v55, %v603_v53 }
 0x116   :  { %v642_v58 = vrot.slane %v641_v56, 1 }
 0x117   :  { %606 = vst [vmem:[%s1213_s6] sm:$0x1] %v605_v57 }
 0x118   :  { %v643_v59 = vadd.f32 %v642_v58, %v641_v56 }
 0x11a   :  { %644 = vst [vmem:[%s1214_s7] sm:$0x1] %v643_v59 }

</bundles_post_ra>
